<compile_context>
chip_gen: v5e
topology: v5e:2x2
jax: 0.10.0
libtpu: 0.0.40
codegen_flags: <defaults>
</compile_context>

<pallas_src>
import functools

import jax
import jax.numpy as jnp
from jax.experimental import pallas as pl
from jax.experimental.pallas import tpu as pltpu

NEG_SLOPE = 0.01  # torch.nn.LeakyReLU default negative_slope


def _leaky_relu(x):
    # identical to where(x >= 0, x, a*x) for 0 < a < 1; one fewer VPU op per element
    return jnp.maximum(x, NEG_SLOPE * x)


def _round_up(x, m):
    return (x + m - 1) // m * m


def _edge_kernel(compute_dtype,
                 s_col_ref, og_col_ref, s_row_ref, o_row_ref, pred_ref,
                 p_so_ref, w1a_p_ref, b1a_ref,
                 w1b_s_ref, b1b_s_ref, w1b_p_ref, b1b_p_ref, w1b_o_ref, b1b_o_ref,
                 pooled_ref, new_p_ref):
    cdt = compute_dtype
    t = pl.program_id(1)

    @pl.when(t == 0)
    def _init():
        pooled_ref[...] = jnp.zeros_like(pooled_ref)

    t_tile = pred_ref.shape[0]
    num_obj = pooled_ref.shape[0]

    s_col = s_col_ref[...]      # (t_tile, 1) int32; padded edges carry -1
    og_col = og_col_ref[...]    # (t_tile, 1) int32; object idx pre-shifted by +O_p (-1 pad)
    s_row = s_row_ref[...]      # (1, t_tile) int32
    o_row = o_row_ref[...]

    # Fused gather one-hot: subject hit in columns [0, O_p), object hit in [O_p, 2*O_p).
    ids_g = jax.lax.broadcasted_iota(jnp.int32, (t_tile, 2 * num_obj), 1)
    oh_g = ((ids_g == s_col) | (ids_g == og_col)).astype(cdt)

    # Scatter-oriented one-hots, built directly (second iota compare, no XLU transpose).
    ids_s = jax.lax.broadcasted_iota(jnp.int32, (num_obj, t_tile), 0)
    oh_s = (ids_s == s_row).astype(cdt)
    oh_o = (ids_s == o_row).astype(cdt)

    pred = pred_ref[...].astype(cdt)   # (t_tile, Dp_p)

    # net1 layer 0: gather fused with the first Linear via the hoisted P_so pre-projection.
    h1 = (jnp.dot(oh_g, p_so_ref[...], preferred_element_type=jnp.float32)
          + jnp.dot(pred, w1a_p_ref[...], preferred_element_type=jnp.float32)
          + b1a_ref[...])
    h1 = _leaky_relu(h1).astype(cdt)   # elementwise stays f32, cast only at matmul input

    # net1 layer 1 (W1b split column-wise: lane-aligned outputs, no 192-offset slicing).
    new_s = jnp.dot(h1, w1b_s_ref[...], preferred_element_type=jnp.float32) + b1b_s_ref[...]
    new_p = jnp.dot(h1, w1b_p_ref[...], preferred_element_type=jnp.float32) + b1b_p_ref[...]
    new_o = jnp.dot(h1, w1b_o_ref[...], preferred_element_type=jnp.float32) + b1b_o_ref[...]

    new_p_ref[...] = _leaky_relu(new_p).astype(new_p_ref.dtype)

    # scatter_add pooling into this split's resident output block (K = t_tile = MXU K fill).
    pooled_ref[...] += (
        jnp.dot(oh_s, new_s.astype(cdt), preferred_element_type=jnp.float32)
        + jnp.dot(oh_o, new_o.astype(cdt), preferred_element_type=jnp.float32))


def _obj_kernel(partials_ref, invc_ref, w2a_ref, b2a_ref, w2b_ref, b2b_ref, out_ref):
    # Combine the per-split pooled partials (n_split is tiny; unrolled adds).
    pooled = partials_ref[0]
    for i in range(1, partials_ref.shape[0]):
        pooled = pooled + partials_ref[i]
    pooled = pooled * invc_ref[...]            # exact avg pooling (inv counts precomputed)
    x = _leaky_relu(pooled)
    x = _leaky_relu(jnp.dot(x, w2a_ref[...], preferred_element_type=jnp.float32)
                    + b2a_ref[...])
    x = _leaky_relu(jnp.dot(x, w2b_ref[...], preferred_element_type=jnp.float32)
                    + b2b_ref[...])
    out_ref[...] = x.astype(out_ref.dtype)


def init_params(key, input_dim, hidden_dim, output_dim, input_dim_pred, output_dim_pred):
    """Deterministic Kaiming-normal-style init (weights stored as (fan_in, fan_out))."""
    dims1_in = 2 * input_dim + input_dim_pred
    dims1_out = 2 * hidden_dim + output_dim_pred

    def linear(k, fan_in, fan_out):
        kw, kb = jax.random.split(k)
        w = jax.random.normal(kw, (fan_in, fan_out), jnp.float32) * jnp.sqrt(2.0 / fan_in)
        bound = 1.0 / jnp.sqrt(fan_in)
        b = jax.random.uniform(kb, (1, fan_out), jnp.float32, -bound, bound)
        return w, b

    k1, k2, k3, k4 = jax.random.split(key, 4)
    w1a, b1a = linear(k1, dims1_in, hidden_dim)      # net1 layer 0
    w1b, b1b = linear(k2, hidden_dim, dims1_out)     # net1 layer 1
    w2a, b2a = linear(k3, hidden_dim, hidden_dim)    # net2 layer 0
    w2b, b2b = linear(k4, hidden_dim, output_dim)    # net2 layer 1
    return (w1a, b1a, w1b, b1b, w2a, b2a, w2b, b2b)


def graph_triple_conv(obj_vecs, pred_vecs, edges, params, *,
                      hidden_dim, output_dim, output_dim_pred,
                      t_tile=256, n_split=2, compute_dtype=jnp.bfloat16):
    w1a, b1a, w1b, b1b, w2a, b2a, w2b, b2b = params
    O, Din = obj_vecs.shape
    T, Dp = pred_vecs.shape
    H, Dout, DpOut = hidden_dim, output_dim, output_dim_pred
    assert w1a.shape == (2 * Din + Dp, H) and w1b.shape == (H, 2 * H + DpOut)
    assert t_tile % 128 == 0 and n_split >= 1
    cdt = compute_dtype

    # Lane-dense padded feature dims; O padded to sublane multiple; T to split*tile multiple.
    Dp_p = _round_up(Dp, 128)
    H_p, Dout_p, DpOut_p = _round_up(H, 128), _round_up(Dout, 128), _round_up(DpOut, 128)
    O_p = _round_up(O, 8)
    T_p = _round_up(T, t_tile * n_split)
    n_inner = T_p // (t_tile * n_split)

    def pad2(x, r, c, dtype=None):
        x = jnp.pad(x, ((0, r - x.shape[0]), (0, c - x.shape[1])))
        return x.astype(dtype) if dtype is not None else x

    # ---- wrapper-side precompute --------------------------------------------------------
    s_idx = edges[:, 0].astype(jnp.int32)
    o_idx = edges[:, 1].astype(jnp.int32)

    # Exact avg-pool counts (depend only on edges): pass 1/max(count,1) into the obj kernel.
    counts = jnp.zeros((O,), jnp.float32).at[s_idx].add(1.0).at[o_idx].add(1.0)
    invc_pd = jnp.pad(1.0 / jnp.maximum(counts, 1.0), (0, O_p - O)).reshape(O_p, 1)

    # Hoisted pre-projections (gather fused with net1 layer 0), row-stacked so the kernel's
    # fused (t_tile, 2*O_p) one-hot does the whole gather in a single matmul.
    hp = jax.lax.Precision.HIGHEST
    P_s = jnp.dot(obj_vecs, w1a[:Din], precision=hp)
    P_o = jnp.dot(obj_vecs, w1a[Din + Dp:], precision=hp)
    p_so = jnp.concatenate([pad2(P_s, O_p, H_p), pad2(P_o, O_p, H_p)], axis=0).astype(cdt)

    w1a_p_pd = pad2(w1a[Din:Din + Dp], Dp_p, H_p, cdt)
    b1a_pd = pad2(b1a, 1, H_p)

    w1b_s = pad2(w1b[:, :H], H_p, H_p, cdt)
    w1b_pp = pad2(w1b[:, H:H + DpOut], H_p, DpOut_p, cdt)
    w1b_o = pad2(w1b[:, H + DpOut:], H_p, H_p, cdt)
    b1b_s = pad2(b1b[:, :H], 1, H_p)
    b1b_pp = pad2(b1b[:, H:H + DpOut], 1, DpOut_p)
    b1b_o = pad2(b1b[:, H + DpOut:], 1, H_p)

    w2a_pd = pad2(w2a, H_p, H_p)
    b2a_pd = pad2(b2a, 1, H_p)
    w2b_pd = pad2(w2b, H_p, Dout_p)
    b2b_pd = pad2(b2b, 1, Dout_p)

    pred_p = pad2(pred_vecs, T_p, Dp_p, cdt)

    # Edge indices: -1 sentinels mask padded rows out of all one-hots; the gather-side object
    # index is pre-shifted by +O_p so one one-hot covers both halves of P_so.
    s_pad = jnp.pad(s_idx, (0, T_p - T), constant_values=-1)
    o_pad = jnp.pad(o_idx, (0, T_p - T), constant_values=-1)
    s_col = s_pad.reshape(T_p, 1)
    og_col = jnp.where(o_pad >= 0, o_pad + O_p, -1).reshape(T_p, 1)
    s_row = s_pad.reshape(1, T_p)
    o_row = o_pad.reshape(1, T_p)

    # ---- edge kernel: grid over (splits, edge tiles) -------------------------------------
    consts = (p_so, w1a_p_pd, b1a_pd, w1b_s, b1b_s, w1b_pp, b1b_pp, w1b_o, b1b_o)

    def const_spec(arr):
        return pl.BlockSpec(arr.shape, lambda c, t: (0, 0))   # VMEM-resident, fetched once

    edge_col = lambda c, t: (c * n_inner + t, 0)
    edge_row = lambda c, t: (0, c * n_inner + t)

    in_specs = ([pl.BlockSpec((t_tile, 1), edge_col),          # s_col
                 pl.BlockSpec((t_tile, 1), edge_col),          # og_col (shifted)
                 pl.BlockSpec((1, t_tile), edge_row),          # s_row
                 pl.BlockSpec((1, t_tile), edge_row),          # o_row
                 pl.BlockSpec((t_tile, Dp_p), edge_col)]       # pred tile
                + [const_spec(a) for a in consts])
    out_specs = (
        pl.BlockSpec((None, O_p, H_p), lambda c, t: (c, 0, 0)),   # per-split pooled partial
        pl.BlockSpec((t_tile, DpOut_p), edge_col),                # new_pred tile
    )
    out_shape = (jax.ShapeDtypeStruct((n_split, O_p, H_p), jnp.float32),
                 jax.ShapeDtypeStruct((T_p, DpOut_p), jnp.float32))

    # VMEM limit from actual buffer bytes (double-buffered) + headroom, capped by capacity.
    itemsize = jnp.dtype(cdt).itemsize
    const_bytes = sum(int(a.size) * a.dtype.itemsize for a in consts)
    tile_bytes = (4 * t_tile * 4 + t_tile * Dp_p * itemsize
                  + O_p * H_p * 4 + t_tile * DpOut_p * 4)
    try:
        vmem_cap = int(0.9 * pltpu.get_tpu_info().vmem_capacity_bytes)
    except Exception:
        vmem_cap = 64 * 1024 * 1024
    vmem_limit = int(min(vmem_cap,
                         max(32 * 1024 * 1024,
                             2 * (const_bytes + tile_bytes) + (16 << 20))))

    flops = 2 * T_p * (2 * O_p * H_p + Dp_p * H_p
                       + H_p * (2 * H_p + DpOut_p) + 2 * O_p * H_p)
    operands = (s_col, og_col, s_row, o_row, pred_p) + consts
    bytes_accessed = (sum(int(a.size) * a.dtype.itemsize for a in operands)
                      + 4 * (n_split * O_p * H_p + T_p * DpOut_p))

    pooled_partials, new_p_p = pl.pallas_call(
        functools.partial(_edge_kernel, cdt),
        out_shape=out_shape,
        grid_spec=pltpu.PrefetchScalarGridSpec(
            num_scalar_prefetch=0,
            grid=(n_split, n_inner),
            in_specs=in_specs,
            out_specs=out_specs),
        compiler_params=pltpu.CompilerParams(
            dimension_semantics=("parallel", "arbitrary"),   # split axis megacore-shardable
            vmem_limit_bytes=vmem_limit),
        cost_estimate=pl.CostEstimate(flops=int(flops), transcendentals=0,
                                      bytes_accessed=int(bytes_accessed)),
    )(*operands)

    # ---- combine partials + avg pooling + net2 (tiny, no grid, whole arrays in VMEM) -----
    new_obj_p = pl.pallas_call(
        _obj_kernel,
        out_shape=jax.ShapeDtypeStruct((O_p, Dout_p), jnp.float32),
    )(pooled_partials, invc_pd, w2a_pd, b2a_pd, w2b_pd, b2b_pd)

    return new_obj_p[:O, :Dout], new_p_p[:T, :DpOut]


def reference_gconv(obj_vecs, pred_vecs, edges, params, H, Dout, DpOut):
    """Pure-JAX reference matching the PyTorch forward (f32, highest precision)."""
    w1a, b1a, w1b, b1b, w2a, b2a, w2b, b2b = params
    hp = jax.lax.Precision.HIGHEST
    s_idx, o_idx = edges[:, 0], edges[:, 1]
    cur_t = jnp.concatenate([obj_vecs[s_idx], pred_vecs, obj_vecs[o_idx]], axis=1)
    h1 = jnp.where(jnp.dot(cur_t, w1a, precision=hp) + b1a >= 0,
                   jnp.dot(cur_t, w1a, precision=hp) + b1a,
                   NEG_SLOPE * (jnp.dot(cur_t, w1a, precision=hp) + b1a))
    new_t = jnp.dot(h1, w1b, precision=hp) + b1b
    new_s = new_t[:, :H]
    new_p = _leaky_relu(new_t[:, H:H + DpOut])
    new_o = new_t[:, H + DpOut:]
    O = obj_vecs.shape[0]
    pooled = jnp.zeros((O, H), jnp.float32).at[s_idx].add(new_s).at[o_idx].add(new_o)
    counts = jnp.zeros((O,), jnp.float32).at[s_idx].add(1.0).at[o_idx].add(1.0)
    pooled = pooled / jnp.maximum(counts, 1.0)[:, None]
    x = _leaky_relu(pooled)
    x = _leaky_relu(jnp.dot(x, w2a, precision=hp) + b2a)
    x = _leaky_relu(jnp.dot(x, w2b, precision=hp) + b2b)
    return x, new_p


if __name__ == "__main__":
    # Deliberately unaligned O / T to exercise padding + edge masking; 128-wide features.
    O, T = 29, 200
    input_dim = input_dim_pred = 128
    hidden_dim = 128
    output_dim = output_dim_pred = 128

    key = jax.random.PRNGKey(0)
    k_obj, k_pred, k_s, k_o, k_params = jax.random.split(key, 5)

    obj_vecs = jax.random.normal(k_obj, (O, input_dim), jnp.float32)
    pred_vecs = jax.random.normal(k_pred, (T, input_dim_pred), jnp.float32)
    s_idx = jax.random.randint(k_s, (T,), 0, O, jnp.int32)
    o_idx = jax.random.randint(k_o, (T,), 0, O, jnp.int32)
    edges = jnp.stack([s_idx, o_idx], axis=1)

    params = init_params(k_params, input_dim, hidden_dim, output_dim,
                         input_dim_pred, output_dim_pred)

    ref_obj, ref_p = reference_gconv(obj_vecs, pred_vecs, edges, params,
                                     hidden_dim, output_dim, output_dim_pred)

    def nerr(a, b):
        return float(jnp.max(jnp.abs(a - b)) / (1.0 + jnp.max(jnp.abs(b))))

    # f32 MXU-operand path
    out_obj, out_p = graph_triple_conv(
        obj_vecs, pred_vecs, edges, params,
        hidden_dim=hidden_dim, output_dim=output_dim, output_dim_pred=output_dim_pred,
        t_tile=256, n_split=2, compute_dtype=jnp.float32)
    jax.block_until_ready((out_obj, out_p))
    assert out_obj.shape == (O, output_dim) and out_p.shape == (T, output_dim_pred)
    assert nerr(out_obj, ref_obj) < 0.1, "new_obj mismatch (f32 path)"
    assert nerr(out_p, ref_p) < 0.05, "new_pred mismatch (f32 path)"

    # Default path: t_tile=256, bf16 MXU operands (f32 accumulation), 2-way split.
    out_obj_bf, out_p_bf = graph_triple_conv(
        obj_vecs, pred_vecs, edges, params,
        hidden_dim=hidden_dim, output_dim=output_dim, output_dim_pred=output_dim_pred)
    jax.block_until_ready((out_obj_bf, out_p_bf))
    assert nerr(out_obj_bf, ref_obj) < 0.2, "new_obj mismatch (bf16 path)"
    assert nerr(out_p_bf, ref_p) < 0.1, "new_pred mismatch (bf16 path)"

    print("KERNEL_OK")
</pallas_src>

<mosaic_0001>
module attributes {stable_mosaic.version = 11 : i64} {
  func.func @_edge_kernel(%arg0: i32, %arg1: i32, %arg2: memref<256x1xi32, #tpu.memory_space<vmem>>, %arg3: memref<256x1xi32, #tpu.memory_space<vmem>>, %arg4: memref<1x256xi32, #tpu.memory_space<vmem>>, %arg5: memref<1x256xi32, #tpu.memory_space<vmem>>, %arg6: memref<256x128xf32, #tpu.memory_space<vmem>>, %arg7: memref<64x128xf32, #tpu.memory_space<vmem>>, %arg8: memref<128x128xf32, #tpu.memory_space<vmem>>, %arg9: memref<1x128xf32, #tpu.memory_space<vmem>>, %arg10: memref<128x128xf32, #tpu.memory_space<vmem>>, %arg11: memref<1x128xf32, #tpu.memory_space<vmem>>, %arg12: memref<128x128xf32, #tpu.memory_space<vmem>>, %arg13: memref<1x128xf32, #tpu.memory_space<vmem>>, %arg14: memref<128x128xf32, #tpu.memory_space<vmem>>, %arg15: memref<1x128xf32, #tpu.memory_space<vmem>>, %arg16: memref<1x32x128xf32, #tpu.memory_space<vmem>>, %arg17: memref<256x128xf32, #tpu.memory_space<vmem>>) attributes {dimension_semantics = [#tpu.dimension_semantics<parallel>, #tpu.dimension_semantics<arbitrary>], iteration_bounds = array<i64: 2, 1>, scalar_prefetch = 0 : i64, scratch_operands = 0 : i64, tpu.core_type = #tpu.core_type<tc>, window_params = [{transform_indices = @transform_0, window_bounds = array<i64: 256, 1>}, {transform_indices = @transform_1, window_bounds = array<i64: 256, 1>}, {transform_indices = @transform_2, window_bounds = array<i64: 1, 256>}, {transform_indices = @transform_3, window_bounds = array<i64: 1, 256>}, {transform_indices = @transform_4, window_bounds = array<i64: 256, 128>}, {pipeline_mode = #tpu.pipeline_mode<synchronous>, transform_indices = @transform_5, window_bounds = array<i64: 64, 128>}, {pipeline_mode = #tpu.pipeline_mode<synchronous>, transform_indices = @transform_6, window_bounds = array<i64: 128, 128>}, {pipeline_mode = #tpu.pipeline_mode<synchronous>, transform_indices = @transform_7, window_bounds = array<i64: 1, 128>}, {pipeline_mode = #tpu.pipeline_mode<synchronous>, transform_indices = @transform_8, window_bounds = array<i64: 128, 128>}, {pipeline_mode = #tpu.pipeline_mode<synchronous>, transform_indices = @transform_9, window_bounds = array<i64: 1, 128>}, {pipeline_mode = #tpu.pipeline_mode<synchronous>, transform_indices = @transform_10, window_bounds = array<i64: 128, 128>}, {pipeline_mode = #tpu.pipeline_mode<synchronous>, transform_indices = @transform_11, window_bounds = array<i64: 1, 128>}, {pipeline_mode = #tpu.pipeline_mode<synchronous>, transform_indices = @transform_12, window_bounds = array<i64: 128, 128>}, {pipeline_mode = #tpu.pipeline_mode<synchronous>, transform_indices = @transform_13, window_bounds = array<i64: 1, 128>}, {transform_indices = @transform_14, window_bounds = array<i64: 1, 32, 128>}, {transform_indices = @transform_15, window_bounds = array<i64: 256, 128>}]} {
    %c0_i32 = arith.constant 0 : i32
    %0 = arith.cmpi eq, %arg1, %c0_i32 : i32
    %1 = arith.extui %0 : i1 to i32
    %c0_i32_0 = arith.constant 0 : i32
    %2 = arith.cmpi ne, %1, %c0_i32_0 : i32
    scf.if %2 {
      %cst_44 = arith.constant 0.000000e+00 : f32
      %64 = vector.broadcast %cst_44 : f32 to vector<32x128xf32>
      %c0_45 = arith.constant 0 : index
      %c0_46 = arith.constant 0 : index
      %c0_47 = arith.constant 0 : index
      %65 = vector.load %arg16[%c0_45, %c0_46, %c0_47] : memref<1x32x128xf32, #tpu.memory_space<vmem>>, vector<1x32x128xf32>
      %66 = vector.shape_cast %65 : vector<1x32x128xf32> to vector<32x128xf32>
      %67 = vector.shape_cast %64 : vector<32x128xf32> to vector<1x32x128xf32>
      tpu.vector_store %arg16[%c0_45, %c0_46, %c0_47], %67 {strides = array<i32>} : memref<1x32x128xf32, #tpu.memory_space<vmem>>, vector<1x32x128xf32>,
    } else {
    }
    %c0 = arith.constant 0 : index
    %c0_1 = arith.constant 0 : index
    %3 = vector.load %arg2[%c0, %c0_1] : memref<256x1xi32, #tpu.memory_space<vmem>>, vector<256x1xi32>
    %c0_2 = arith.constant 0 : index
    %c0_3 = arith.constant 0 : index
    %4 = vector.load %arg3[%c0_2, %c0_3] : memref<256x1xi32, #tpu.memory_space<vmem>>, vector<256x1xi32>
    %c0_4 = arith.constant 0 : index
    %c0_5 = arith.constant 0 : index
    %5 = vector.load %arg4[%c0_4, %c0_5] : memref<1x256xi32, #tpu.memory_space<vmem>>, vector<1x256xi32>
    %c0_6 = arith.constant 0 : index
    %c0_7 = arith.constant 0 : index
    %6 = vector.load %arg5[%c0_6, %c0_7] : memref<1x256xi32, #tpu.memory_space<vmem>>, vector<1x256xi32>
    %7 = tpu.iota {dimensions = array<i32: 1>} : vector<256x64xi32>
    %8 = vector.broadcast %3 : vector<256x1xi32> to vector<256x64xi32>
    %9 = arith.cmpi eq, %7, %8 : vector<256x64xi32>
    %10 = vector.broadcast %4 : vector<256x1xi32> to vector<256x64xi32>
    %11 = arith.cmpi eq, %7, %10 : vector<256x64xi32>
    %12 = arith.ori %9, %11 : vector<256x64xi1>
    %13 = arith.extui %12 : vector<256x64xi1> to vector<256x64xi32>
    %14 = arith.sitofp %13 : vector<256x64xi32> to vector<256x64xf32>
    %15 = tpu.iota {dimensions = array<i32: 0>} : vector<32x256xi32>
    %16 = vector.broadcast %5 : vector<1x256xi32> to vector<32x256xi32>
    %17 = arith.cmpi eq, %15, %16 : vector<32x256xi32>
    %18 = arith.extui %17 : vector<32x256xi1> to vector<32x256xi32>
    %19 = arith.sitofp %18 : vector<32x256xi32> to vector<32x256xf32>
    %20 = vector.broadcast %6 : vector<1x256xi32> to vector<32x256xi32>
    %21 = arith.cmpi eq, %15, %20 : vector<32x256xi32>
    %22 = arith.extui %21 : vector<32x256xi1> to vector<32x256xi32>
    %23 = arith.sitofp %22 : vector<32x256xi32> to vector<32x256xf32>
    %c0_8 = arith.constant 0 : index
    %c0_9 = arith.constant 0 : index
    %24 = vector.load %arg6[%c0_8, %c0_9] : memref<256x128xf32, #tpu.memory_space<vmem>>, vector<256x128xf32>
    %c0_10 = arith.constant 0 : index
    %c0_11 = arith.constant 0 : index
    %25 = vector.load %arg7[%c0_10, %c0_11] : memref<64x128xf32, #tpu.memory_space<vmem>>, vector<64x128xf32>
    %cst = arith.constant dense<0.000000e+00> : vector<256x128xf32>
    %26 = tpu.matmul %14, %25, %cst {dimension_numbers = #tpu.dot_dimension_numbers<[1], [0], [0], [1], [0, 0, 1, 1], [], []>} : vector<256x64xf32>, vector<64x128xf32>, vector<256x128xf32> -> vector<256x128xf32>
    %c0_12 = arith.constant 0 : index
    %c0_13 = arith.constant 0 : index
    %27 = vector.load %arg8[%c0_12, %c0_13] : memref<128x128xf32, #tpu.memory_space<vmem>>, vector<128x128xf32>
    %cst_14 = arith.constant dense<0.000000e+00> : vector<256x128xf32>
    %28 = tpu.matmul %24, %27, %cst_14 {dimension_numbers = #tpu.dot_dimension_numbers<[1], [0], [0], [1], [0, 0, 1, 1], [], []>} : vector<256x128xf32>, vector<128x128xf32>, vector<256x128xf32> -> vector<256x128xf32>
    %29 = arith.addf %26, %28 : vector<256x128xf32>
    %c0_15 = arith.constant 0 : index
    %c0_16 = arith.constant 0 : index
    %30 = vector.load %arg9[%c0_15, %c0_16] : memref<1x128xf32, #tpu.memory_space<vmem>>, vector<1x128xf32>
    %31 = vector.broadcast %30 : vector<1x128xf32> to vector<256x128xf32>
    %32 = arith.addf %29, %31 : vector<256x128xf32>
    %cst_17 = arith.constant 0.00999999977 : f32
    %33 = vector.broadcast %cst_17 : f32 to vector<256x128xf32>
    %34 = arith.mulf %33, %32 : vector<256x128xf32>
    %35 = arith.maximumf %32, %34 : vector<256x128xf32>
    %c0_18 = arith.constant 0 : index
    %c0_19 = arith.constant 0 : index
    %36 = vector.load %arg10[%c0_18, %c0_19] : memref<128x128xf32, #tpu.memory_space<vmem>>, vector<128x128xf32>
    %cst_20 = arith.constant dense<0.000000e+00> : vector<256x128xf32>
    %37 = tpu.matmul %35, %36, %cst_20 {dimension_numbers = #tpu.dot_dimension_numbers<[1], [0], [0], [1], [0, 0, 1, 1], [], []>} : vector<256x128xf32>, vector<128x128xf32>, vector<256x128xf32> -> vector<256x128xf32>
    %c0_21 = arith.constant 0 : index
    %c0_22 = arith.constant 0 : index
    %38 = vector.load %arg11[%c0_21, %c0_22] : memref<1x128xf32, #tpu.memory_space<vmem>>, vector<1x128xf32>
    %39 = vector.broadcast %38 : vector<1x128xf32> to vector<256x128xf32>
    %40 = arith.addf %37, %39 : vector<256x128xf32>
    %c0_23 = arith.constant 0 : index
    %c0_24 = arith.constant 0 : index
    %41 = vector.load %arg12[%c0_23, %c0_24] : memref<128x128xf32, #tpu.memory_space<vmem>>, vector<128x128xf32>
    %cst_25 = arith.constant dense<0.000000e+00> : vector<256x128xf32>
    %42 = tpu.matmul %35, %41, %cst_25 {dimension_numbers = #tpu.dot_dimension_numbers<[1], [0], [0], [1], [0, 0, 1, 1], [], []>} : vector<256x128xf32>, vector<128x128xf32>, vector<256x128xf32> -> vector<256x128xf32>
    %c0_26 = arith.constant 0 : index
    %c0_27 = arith.constant 0 : index
    %43 = vector.load %arg13[%c0_26, %c0_27] : memref<1x128xf32, #tpu.memory_space<vmem>>, vector<1x128xf32>
    %44 = vector.broadcast %43 : vector<1x128xf32> to vector<256x128xf32>
    %45 = arith.addf %42, %44 : vector<256x128xf32>
    %c0_28 = arith.constant 0 : index
    %c0_29 = arith.constant 0 : index
    %46 = vector.load %arg14[%c0_28, %c0_29] : memref<128x128xf32, #tpu.memory_space<vmem>>, vector<128x128xf32>
    %cst_30 = arith.constant dense<0.000000e+00> : vector<256x128xf32>
    %47 = tpu.matmul %35, %46, %cst_30 {dimension_numbers = #tpu.dot_dimension_numbers<[1], [0], [0], [1], [0, 0, 1, 1], [], []>} : vector<256x128xf32>, vector<128x128xf32>, vector<256x128xf32> -> vector<256x128xf32>
    %c0_31 = arith.constant 0 : index
    %c0_32 = arith.constant 0 : index
    %48 = vector.load %arg15[%c0_31, %c0_32] : memref<1x128xf32, #tpu.memory_space<vmem>>, vector<1x128xf32>
    %49 = vector.broadcast %48 : vector<1x128xf32> to vector<256x128xf32>
    %50 = arith.addf %47, %49 : vector<256x128xf32>
    %cst_33 = arith.constant 0.00999999977 : f32
    %51 = vector.broadcast %cst_33 : f32 to vector<256x128xf32>
    %52 = arith.mulf %51, %45 : vector<256x128xf32>
    %53 = arith.maximumf %45, %52 : vector<256x128xf32>
    %c0_34 = arith.constant 0 : index
    %c0_35 = arith.constant 0 : index
    %54 = vector.load %arg17[%c0_34, %c0_35] : memref<256x128xf32, #tpu.memory_space<vmem>>, vector<256x128xf32>
    tpu.vector_store %arg17[%c0_34, %c0_35], %53 {strides = array<i32>} : memref<256x128xf32, #tpu.memory_space<vmem>>, vector<256x128xf32>,
    %c0_36 = arith.constant 0 : index
    %c0_37 = arith.constant 0 : index
    %c0_38 = arith.constant 0 : index
    %55 = vector.load %arg16[%c0_36, %c0_37, %c0_38] : memref<1x32x128xf32, #tpu.memory_space<vmem>>, vector<1x32x128xf32>
    %56 = vector.shape_cast %55 : vector<1x32x128xf32> to vector<32x128xf32>
    %cst_39 = arith.constant dense<0.000000e+00> : vector<32x128xf32>
    %57 = tpu.matmul %19, %40, %cst_39 {dimension_numbers = #tpu.dot_dimension_numbers<[1], [0], [0], [1], [0, 0, 1, 1], [], []>} : vector<32x256xf32>, vector<256x128xf32>, vector<32x128xf32> -> vector<32x128xf32>
    %cst_40 = arith.constant dense<0.000000e+00> : vector<32x128xf32>
    %58 = tpu.matmul %23, %50, %cst_40 {dimension_numbers = #tpu.dot_dimension_numbers<[1], [0], [0], [1], [0, 0, 1, 1], [], []>} : vector<32x256xf32>, vector<256x128xf32>, vector<32x128xf32> -> vector<32x128xf32>
    %59 = arith.addf %57, %58 : vector<32x128xf32>
    %60 = arith.addf %56, %59 : vector<32x128xf32>
    %c0_41 = arith.constant 0 : index
    %c0_42 = arith.constant 0 : index
    %c0_43 = arith.constant 0 : index
    %61 = vector.load %arg16[%c0_41, %c0_42, %c0_43] : memref<1x32x128xf32, #tpu.memory_space<vmem>>, vector<1x32x128xf32>
    %62 = vector.shape_cast %61 : vector<1x32x128xf32> to vector<32x128xf32>
    %63 = vector.shape_cast %60 : vector<32x128xf32> to vector<1x32x128xf32>
    tpu.vector_store %arg16[%c0_41, %c0_42, %c0_43], %63 {strides = array<i32>} : memref<1x32x128xf32, #tpu.memory_space<vmem>>, vector<1x32x128xf32>,
    return
  }
  func.func @transform_0(%arg0: i32, %arg1: i32) -> (i32, i32) {
    %c1_i32 = arith.constant 1 : i32
    %0 = arith.muli %arg0, %c1_i32 : i32
    %1 = arith.addi %0, %arg1 : i32
    %c0_i32 = arith.constant 0 : i32
    %c0_i32_0 = arith.constant 0 : i32
    return %1, %c0_i32 : i32, i32
  }
  func.func @transform_1(%arg0: i32, %arg1: i32) -> (i32, i32) {
    %c1_i32 = arith.constant 1 : i32
    %0 = arith.muli %arg0, %c1_i32 : i32
    %1 = arith.addi %0, %arg1 : i32
    %c0_i32 = arith.constant 0 : i32
    %c0_i32_0 = arith.constant 0 : i32
    return %1, %c0_i32 : i32, i32
  }
  func.func @transform_2(%arg0: i32, %arg1: i32) -> (i32, i32) {
    %c1_i32 = arith.constant 1 : i32
    %0 = arith.muli %arg0, %c1_i32 : i32
    %1 = arith.addi %0, %arg1 : i32
    %c0_i32 = arith.constant 0 : i32
    %c0_i32_0 = arith.constant 0 : i32
    return %c0_i32, %1 : i32, i32
  }
  func.func @transform_3(%arg0: i32, %arg1: i32) -> (i32, i32) {
    %c1_i32 = arith.constant 1 : i32
    %0 = arith.muli %arg0, %c1_i32 : i32
    %1 = arith.addi %0, %arg1 : i32
    %c0_i32 = arith.constant 0 : i32
    %c0_i32_0 = arith.constant 0 : i32
    return %c0_i32, %1 : i32, i32
  }
  func.func @transform_4(%arg0: i32, %arg1: i32) -> (i32, i32) {
    %c1_i32 = arith.constant 1 : i32
    %0 = arith.muli %arg0, %c1_i32 : i32
    %1 = arith.addi %0, %arg1 : i32
    %c0_i32 = arith.constant 0 : i32
    %c0_i32_0 = arith.constant 0 : i32
    return %1, %c0_i32 : i32, i32
  }
  func.func @transform_5(%arg0: i32, %arg1: i32) -> (i32, i32) {
    %c0_i32 = arith.constant 0 : i32
    %c0_i32_0 = arith.constant 0 : i32
    %c0_i32_1 = arith.constant 0 : i32
    return %c0_i32, %c0_i32_0 : i32, i32
  }
  func.func @transform_6(%arg0: i32, %arg1: i32) -> (i32, i32) {
    %c0_i32 = arith.constant 0 : i32
    %c0_i32_0 = arith.constant 0 : i32
    %c0_i32_1 = arith.constant 0 : i32
    return %c0_i32, %c0_i32_0 : i32, i32
  }
  func.func @transform_7(%arg0: i32, %arg1: i32) -> (i32, i32) {
    %c0_i32 = arith.constant 0 : i32
    %c0_i32_0 = arith.constant 0 : i32
    %c0_i32_1 = arith.constant 0 : i32
    return %c0_i32, %c0_i32_0 : i32, i32
  }
  func.func @transform_8(%arg0: i32, %arg1: i32) -> (i32, i32) {
    %c0_i32 = arith.constant 0 : i32
    %c0_i32_0 = arith.constant 0 : i32
    %c0_i32_1 = arith.constant 0 : i32
    return %c0_i32, %c0_i32_0 : i32, i32
  }
  func.func @transform_9(%arg0: i32, %arg1: i32) -> (i32, i32) {
    %c0_i32 = arith.constant 0 : i32
    %c0_i32_0 = arith.constant 0 : i32
    %c0_i32_1 = arith.constant 0 : i32
    return %c0_i32, %c0_i32_0 : i32, i32
  }
  func.func @transform_10(%arg0: i32, %arg1: i32) -> (i32, i32) {
    %c0_i32 = arith.constant 0 : i32
    %c0_i32_0 = arith.constant 0 : i32
    %c0_i32_1 = arith.constant 0 : i32
    return %c0_i32, %c0_i32_0 : i32, i32
  }
  func.func @transform_11(%arg0: i32, %arg1: i32) -> (i32, i32) {
    %c0_i32 = arith.constant 0 : i32
    %c0_i32_0 = arith.constant 0 : i32
    %c0_i32_1 = arith.constant 0 : i32
    return %c0_i32, %c0_i32_0 : i32, i32
  }
  func.func @transform_12(%arg0: i32, %arg1: i32) -> (i32, i32) {
    %c0_i32 = arith.constant 0 : i32
    %c0_i32_0 = arith.constant 0 : i32
    %c0_i32_1 = arith.constant 0 : i32
    return %c0_i32, %c0_i32_0 : i32, i32
  }
  func.func @transform_13(%arg0: i32, %arg1: i32) -> (i32, i32) {
    %c0_i32 = arith.constant 0 : i32
    %c0_i32_0 = arith.constant 0 : i32
    %c0_i32_1 = arith.constant 0 : i32
    return %c0_i32, %c0_i32_0 : i32, i32
  }
  func.func @transform_14(%arg0: i32, %arg1: i32) -> (i32, i32, i32) {
    %c0_i32 = arith.constant 0 : i32
    %c0_i32_0 = arith.constant 0 : i32
    %c0_i32_1 = arith.constant 0 : i32
    return %arg0, %c0_i32, %c0_i32_0 : i32, i32, i32
  }
  func.func @transform_15(%arg0: i32, %arg1: i32) -> (i32, i32) {
    %c1_i32 = arith.constant 1 : i32
    %0 = arith.muli %arg0, %c1_i32 : i32
    %1 = arith.addi %0, %arg1 : i32
    %c0_i32 = arith.constant 0 : i32
    %c0_i32_0 = arith.constant 0 : i32
    return %1, %c0_i32 : i32, i32
  }
}

</mosaic_0001>

<bundles_post_ra>
// kernel: tpu_custom_call.1
= control target key start
LH: loop header
LB: loop body
LE: loop exit
PB: predicated region body
PF: predicated region fallthrough
CT: control target
= control target key end

     0   :  { %s4291_s0 = inlined_call_operand.vmem [shape: s32[512,1], index: 0, kind: input, shape index: {}]   ;;  %s4292_s1 = inlined_call_operand.vmem [shape: s32[512,1], index: 1, kind: input, shape index: {}]   ;;  %s4293_s2 = inlined_call_operand.vmem [shape: s32[1,512], index: 2, kind: input, shape index: {}]   ;;  %s4294_s3 = inlined_call_operand.vmem [shape: s32[1,512], index: 3, kind: input, shape index: {}]   ;;  %s4295_s4 = inlined_call_operand.vmem [shape: f32[512,128], index: 4, kind: input, shape index: {}]   ;;  %s4296_s5 = inlined_call_operand.hbm [shape: f32[64,128], index: 5, kind: input, shape index: {}]   ;;  %s4297_s6 = inlined_call_operand.vmem [shape: f32[128,128], index: 6, kind: input, shape index: {}]   ;;  %s4298_s7 = inlined_call_operand.hbm [shape: f32[1,128], index: 7, kind: input, shape index: {}]   ;;  %s4299_s8 = inlined_call_operand.vmem [shape: f32[128,128], index: 8, kind: input, shape index: {}]   ;;  %s4300_s9 = inlined_call_operand.hbm [shape: f32[1,128], index: 9, kind: input, shape index: {}]   ;;  %s4301_s10 = inlined_call_operand.vmem [shape: f32[128,128], index: 10, kind: input, shape index: {}]   ;;  %s4302_s11 = inlined_call_operand.vmem [shape: f32[1,128], index: 11, kind: input, shape index: {}]   ;;  %s4303_s12 = inlined_call_operand.vmem [shape: f32[128,128], index: 12, kind: input, shape index: {}]   ;;  %s4304_s13 = inlined_call_operand.vmem [shape: f32[1,128], index: 13, kind: input, shape index: {}]   ;;  %s4305_s14 = inlined_call_operand.hbm [shape: f32[2,32,128], index: 14, kind: output, shape index: {0}]   ;;  %s4306_s15 = inlined_call_operand.hbm [shape: f32[512,128], index: 15, kind: output, shape index: {1}]  }
   0x1   :  { %4318 = sst [smem:[#allocation23_spill]] %s4291_s0 }
   0x2   :  { %4319 = sst [smem:[#allocation24_spill]] %s4293_s2 }
   0x3   :  { %4320 = sst [smem:[#allocation25_spill]] %s4298_s7 }
   0x4   :  { %4321 = sst [smem:[#allocation26_spill]] %s4305_s14 }
   0x5   :  { %4322 = sst [smem:[#allocation27_spill]] %s4306_s15 }
   0x6   :  { %21 = vsyncpa [#allocation3], 0 }
   0x7   :  { %22 = vsyncpa [#allocation6], 0 }
   0x8   :  { %23 = vsyncpa [#allocation4], 0 }
   0x9   :  { %25 = vsyncpa [#allocation4 + $0x1], 0 }
   0xa   :  { %26 = vsyncpa [#allocation10], 0 }
   0xb   :  { %28 = vsyncpa [#allocation10 + $0x1], 0  ;;  %s3036_s18 = smov 0   ;;  %s3038_s19 = smov 0  }
   0xc   :  { %s3040_s20 = smov 0   ;;  %s3042_s21 = smov 0  }
   0xd   :  { %s3044_s22 = smov 0   ;;  %s3046_s23 = smov 0  }
   0xe LB: > { %4323 = sst [smem:[#allocation15_spill]] %s2924_s18  ;;  %s2488_s24 = sadd.s32 4294967295, %s2944_s23   ;;  %s2944_s23 = sphi %s3046_s23, %s34_s23   ;;  %s2940_s22 = sphi %s3044_s22, %s4348_s22   ;;  %s2936_s21 = sphi %s3042_s21, %s4347_s21   ;;  %s2932_s20 = sphi %s3040_s20, %s4346_s20   ;;  %s2928_s19 = sphi %s3038_s19, %s4350_s19   ;;  %s2924_s18 = sphi %s3036_s18, %s4349_s18  }
   0xf   : > { %4324 = sst [smem:[#allocation16_spill]] %s2932_s20  ;;  %s2489_s25 = sadd.s32 4294967294, %s2944_s23  }
  0x10   : > { %4325 = sst [smem:[#allocation17_spill]] %s2940_s22  ;;  %s46_s26 = sadd.s32 1, %s2940_s22 }
  0x11   : > { %4326 = sst [smem:[#allocation18_spill]] %s2944_s23  ;;  %s382_s27 = sadd.s32 1, %s2932_s20 }
  0x12   : > { %p48_p0 = scmp.ge.s32.totalorder %s46_s26, 2  ;;  %p392_p1 = scmp.ne.s32.totalorder %s2932_s20, %s2928_s19 }
  0x13   : > { %p393_p2 = scmp.eq.s32.totalorder %s2488_s24, 1  ;;  %p398_p3 = scmp.ne.s32.totalorder %s2928_s19, %s2924_s18 }
  0x14   : > { %s4352_s26 = smov (%p48_p0, %s46_s26), 0  ;;  %p399_p5 = scmp.eq.s32.totalorder %s2489_s25, 1 }
  0x15   : > { %4327 = sst [smem:[#allocation19_spill]] %s4352_s26  ;;  %p3076_p4 = por %p393_p2, %p392_p1 }
  0x16   : > { %s379_s29 = ssub.s32 %s2940_s22, %s4352_s26  ;;  %p2490_p6 = scmp.ge.s32.totalorder %s2944_s23, 1 }
  0x17   : > { %s4328_s28 = scalar_select %p3076_p4, 1, 0 }
  0x18   : > { %p380_p7 = scmp.eq.s32.totalorder %s379_s29, 0  ;;  %p3083_p8 = por %p399_p5, %p398_p3 }
  0x19   : > { %4329 = sst [smem:[#allocation20_spill]] %s4328_s28  ;;  %p434_p9 = scmp.lt.s32.totalorder %s2944_s23, 3 }
  0x1a   : > { %s4330_s30 = scalar_select %p3083_p8, 1, 0 }
  0x1b   : > { %s3089_s16 = scalar_select %p380_p7, %s2932_s20, %s382_s27  }
  0x1c   : > { %4331 = sst [smem:[#allocation21_spill]] %s4330_s30  ;;  %p3091_p10 = pnand %p2490_p6, %p434_p9 }
  0x1d   : > { %4332 = sst [smem:[#allocation22_spill]] %s3089_s16  ;;  %p3095_p11 = scmp.eq.s32.totalorder %s2488_s24, 0 }
  0x1e   : > { %s4335_s7 = sld [smem:[#allocation25_spill]]  ;;  %p2647_p12 = pneg %p3091_p10 }
  0x1f   : > { %s2946_s22 = smov [#allocation5]   ;;  %s445_s26 = sshll.u32 %s4296_s5, 4  ;;  %s446_s26 = int_to_ptr.hbm [resolvable:$true] %s445_s26 }
  0x20   : > { %s465_s27 = sshll.u32 %s2946_s22, 4  ;;  %p3106_p13 = pnand %p3095_p11, %p2647_p12  ;;  %s466_s27 = int_to_ptr.vmem [resolvable:$true] %s465_s27 }
  0x21   : > { %s2947_s25 = smov [#allocation2]   ;;  %s478_s23 = sshll.u32 %s4300_s9, 4  ;;  %s479_s23 = int_to_ptr.hbm [resolvable:$true] %s478_s23 }
  0x22   : > { %s2948_s14 = smov 128   ;;  %s2949_s15 = smov 8  }
  0x23   : > { %s2950_s28 = smov [#allocation7]  }
  0x24   : > { %s463_s29 = sshll.u32 %s4335_s7, 4  ;;  %s447_s7 = sshll.u32 %s2947_s25, 4  ;;  %s464_s29 = int_to_ptr.hbm [resolvable:$true] %s463_s29  ;;  %s448_s7 = int_to_ptr.vmem [resolvable:$true] %s447_s7 }
  0x25   : > { %2653 = dma.hbm_to_vmem [thread:$0]  (!%p3106_p13), %s464_s29, 16, %s466_s27, [#allocation6]  }
  0x26   : > { %2650 = dma.hbm_to_vmem [thread:$0]  (!%p3106_p13), %s446_s26, 1024, %s448_s7, [#allocation3], %s2948_s14, %s2948_s14, %s2949_s15  }
  0x27   : > { %s480_s2 = sshll.u32 %s2950_s28, 4  ;;  %558 = sbr.rel (%p3091_p10) target bundleno = 888 (0x378), region = 76  ;;  %s481_s2 = int_to_ptr.vmem [resolvable:$true] %s480_s2 }
  0x28   : > { %2656 = dma.hbm_to_vmem [thread:$0]  (!%p3106_p13), %s479_s23, 16, %s481_s2, [#allocation6]  }
  0x2c   : > { %2907 = dma.done.wait (%p3095_p11), [#allocation3], 1024  }
  0x2d   : > { %2909 = vsyncadd (%p3095_p11), [#allocation3], 4294966272 }
  0x2e   : > { %2911 = dma.done.wait (%p3095_p11), [#allocation6], 32  }
  0x2f   : > { %2913 = vsyncadd (%p3095_p11), [#allocation6], 4294967264  ;;  %s3133_s7 = sshll.u32 %s2936_s21, 5  ;;  %v2951_v0 = vmov 0   ;;  %s4337_s0 = sld [smem:[#allocation23_spill]]  ;;  %v1225_v6 = vld [vmem:[%s4297_s6 + $0x78] sm:$0xff] }
  0x30   : > { %2731 = vset.pattern.permute.xlu2 %v2951_v0  ;;  %2730 = vset.pattern.permute.xlu1 %v2951_v0  ;;  %p647_p0 = scmp.lt.s32.totalorder %s3133_s7, 63  ;;  %v1224_v7 = vld [vmem:[%s4297_s6 + $0x70] sm:$0xff]  ;;  %v1223_v9 = vld [vmem:[%s4297_s6 + $0x68] sm:$0xff]  ;;  %v1222_v10 = vld [vmem:[%s4297_s6 + $0x60] sm:$0xff]  ;;  %vm1339_vm2 = vcmask 523264   ;;  %s3847_s16 = sand.u32 1, %s2928_s19  }
  0x31   : > { %2729 = vset.pattern.permute.xlu0 %v2951_v0  ;;  %1226 = vmatpush.msra.mxu0 %v1225_v6  ;;  %v1221_v11 = vld [vmem:[%s4297_s6 + $0x58] sm:$0xff]  ;;  %v1220_v15 = vld [vmem:[%s4297_s6 + $0x50] sm:$0xff]  ;;  %v1219_v16 = vld [vmem:[%s4297_s6 + $0x48] sm:$0xff]  ;;  %s2500_s17 = sshll.u32 %s3847_s16, 8  ;;  %s2505_s25 = sshll.u32 %s2936_s21, 1 }
  0x32   : > { %s648_s2 = scalar_select %p647_p0, %s3133_s7, 63  ;;  %v1218_v17 = vld [vmem:[%s4297_s6 + $0x40] sm:$0xff]  ;;  %v1217_v18 = vld [vmem:[%s4297_s6 + $0x38] sm:$0xff]  ;;  %v1216_v22 = vld [vmem:[%s4297_s6 + $0x30] sm:$0xff] }
  0x33   : > { %1227 = vmatpush.msra.mxu0 %v1224_v7  ;;  %v1215_v23 = vld [vmem:[%s4297_s6 + $0x28] sm:$0xff]  ;;  %v1214_v24 = vld [vmem:[%s4297_s6 + $0x20] sm:$0xff]  ;;  %v1213_v25 = vld [vmem:[%s4297_s6 + $0x18] sm:$0xff]  ;;  %s3862_s29 = scalar_lea.vmem [#allocation9], %s2500_s17  ;;  %p663_p1 = scmp.lt.s32.totalorder %s2505_s25, 3 }
  0x34   : > { %s3137_s14 = sshll.u32 %s648_s2, 3  ;;  %v1212_v29 = vld [vmem:[%s4297_s6 + $0x10] sm:$0xff]  ;;  %v1211_v30 = vld [vmem:[%s4297_s6 + $0x8] sm:$0xff]  ;;  %v1210_v31 = vld [vmem:[%s4297_s6] sm:$0xff]  ;;  %s4338_s15 = sld [smem:[#allocation24_spill]] }
  0x35   : > { %s3143_s18 = scalar_lea.vmem %s4337_s0, %s3137_s14  ;;  %s3152_s30 = scalar_lea.vmem %s4292_s1, %s3137_s14  ;;  %1228 = vmatpush.msra.mxu0 %v1223_v9  ;;  %v1209_v53 = vld [vmem:[#allocation2 + $0x38] sm:$0xff]  ;;  %v1208_v57 = vld [vmem:[#allocation2 + $0x30] sm:$0xff]  ;;  %v1207_v58 = vld [vmem:[#allocation2 + $0x28] sm:$0xff] }
  0x36   : > { %v695_v1 = vld [vmem:[%s3143_s18 + $0x10] sm:$0xff]  ;;  %v694_v2 = vld [vmem:[%s3143_s18 + $0x8] sm:$0xff]  ;;  %v693_v3 = vld [vmem:[%s3143_s18] sm:$0xff]  ;;  %s3212_s24 = scalar_lea.vmem %s4295_s4, %s3137_s14  ;;  %1444 = vmatpush.msra.mxu1 %v1209_v53  ;;  %2615 = vmatpush.msra.mxu2 %v1209_v53  ;;  %s4354_s25 = smov (!%p663_p1, %s2505_s25), 3 }
  0x37   : > { %768 = vperm.xlu2 %2731, %v695_v1   ;;  %765 = vperm.xlu1 %2730, %v694_v2   ;;  %v727_v4 = vld [vmem:[%s3152_s30 + $0x10] sm:$0xff]  ;;  %v726_v5 = vld [vmem:[%s3152_s30 + $0x8] sm:$0xff]  ;;  %v725_v8 = vld [vmem:[%s3152_s30] sm:$0xff]  ;;  %s672_s14 = scalar_lea.vmem %s4294_s3, %s4354_s25  ;;  %s4340_s27 = sld [smem:[#allocation27_spill]] }
  0x38   : > { %762 = vperm.xlu0 %2729, %v693_v3   ;;  %1229 = vmatpush.msra.mxu0 %v1222_v10  ;;  %v697_v12 = vld [vmem:[%s3143_s18 + $0x20] sm:$0xff]  ;;  %v728_v13 = vld [vmem:[%s3152_s30 + $0x18] sm:$0xff]  ;;  %v730_v19 = vld [vmem:[%s3152_s30 + $0x28] sm:$0xff]  ;;  %s2278_s2 = scalar_lea.sflag [#allocation10], %s3847_s16 }
  0x39   : > { %v696_v14 = vld [vmem:[%s3143_s18 + $0x18] sm:$0xff]  ;;  %v698_v20 = vld [vmem:[%s3143_s18 + $0x28] sm:$0xff]  ;;  %v729_v21 = vld [vmem:[%s3152_s30 + $0x20] sm:$0xff]  ;;  %2616 = vmatpush.msra.mxu3 %v1209_v53  ;;  %1445 = vmatpush.msra.mxu1 %v1208_v57 }
  0x3a   : > { %1230 = vmatpush.msra.mxu0 %v1221_v11  ;;  %v700_v26 = vld [vmem:[%s3143_s18 + $0x38] sm:$0xff]  ;;  %v731_v27 = vld [vmem:[%s3152_s30 + $0x30] sm:$0xff]  ;;  %v1170_v32 = vld [vmem:[%s3212_s24] sm:$0xff]  ;;  %2617 = vmatpush.msra.mxu2 %v1208_v57  ;;  %s665_s20 = scalar_lea.vmem %s4338_s15, %s4354_s25  ;;  %s2308_s25 = sshll.u32 %s3862_s29, 4  ;;  %s2309_s25 = int_to_ptr.vmem [resolvable:$true] %s2308_s25 }
  0x3b   : > { %v699_v28 = vld [vmem:[%s3143_s18 + $0x30] sm:$0xff]  ;;  %v733_v33 = vld [vmem:[%s3152_s30 + $0x40] sm:$0xff]  ;;  %v732_v35 = vld [vmem:[%s3152_s30 + $0x38] sm:$0xff]  ;;  %2618 = vmatpush.msra.mxu3 %v1208_v57  ;;  %1446 = vmatpush.msra.mxu1 %v1207_v58 }
  0x3c   : > { %1231 = vmatpush.msra.mxu0 %v1220_v15  ;;  %v701_v34 = vld [vmem:[%s3143_s18 + $0x40] sm:$0xff]  ;;  %v1171_v36 = vld [vmem:[%s3212_s24 + $0x8] sm:$0xff]  ;;  %v1172_v40 = vld [vmem:[%s3212_s24 + $0x10] sm:$0xff]  ;;  %2619 = vmatpush.msra.mxu2 %v1207_v58 }
  0x3d   : > { %v702_v37 = vld [vmem:[%s3143_s18 + $0x48] sm:$0xff]  ;;  %v739_v41 = vld [vmem:[%s3152_s30 + $0x70] sm:$0xff]  ;;  %v1173_v44 = vld [vmem:[%s3212_s24 + $0x18] sm:$0xff]  ;;  %2620 = vmatpush.msra.mxu3 %v1207_v58  ;;  %s2846_s15 = scalar_lea.hbm %s4340_s27, 512 }
  0x3e   : > { %1232 = vmatpush.msra.mxu0 %v1219_v16  ;;  %v738_v38 = vld [vmem:[%s3152_s30 + $0x68] sm:$0xff]  ;;  %v707_v42 = vld [vmem:[%s3143_s18 + $0x70] sm:$0xff]  ;;  %v708_v45 = vld [vmem:[%s3143_s18 + $0x78] sm:$0xff] }
  0x3f   : > { %896 = vperm.xlu2 %2731, %v727_v4   ;;  %893 = vperm.xlu1 %2730, %v726_v5   ;;  %v706_v39 = vld [vmem:[%s3143_s18 + $0x68] sm:$0xff]  ;;  %v735_v46 = vld [vmem:[%s3152_s30 + $0x50] sm:$0xff]  ;;  %v1174_v48 = vld [vmem:[%s3212_s24 + $0x20] sm:$0xff] }
  0x40   : > { %890 = vperm.xlu0 %2729, %v725_v8   ;;  %1233 = vmatpush.msra.mxu0 %v1218_v17  ;;  %v734_v43 = vld [vmem:[%s3152_s30 + $0x48] sm:$0xff]  ;;  %v703_v47 = vld [vmem:[%s3143_s18 + $0x50] sm:$0xff]  ;;  %v736_v49 = vld [vmem:[%s3152_s30 + $0x58] sm:$0xff] }
  0x41   : > { %v704_v50 = vld [vmem:[%s3143_s18 + $0x58] sm:$0xff]  ;;  %v1175_v52 = vld [vmem:[%s3212_s24 + $0x28] sm:$0xff]  ;;  %v705_v54 = vld [vmem:[%s3143_s18 + $0x60] sm:$0xff] }
  0x42   : > { %1234 = vmatpush.msra.mxu0 %v1217_v18  ;;  %v740_v51 = vld [vmem:[%s3152_s30 + $0x78] sm:$0xff]  ;;  %v741_v55 = vld [vmem:[%s3152_s30 + $0x80] sm:$0xff]  ;;  %v1176_v59 = vld [vmem:[%s3212_s24 + $0x30] sm:$0xff] }
  0x43   : > { %v709_v56 = vld [vmem:[%s3143_s18 + $0x80] sm:$0xff]  ;;  %v742_v61 = vld [vmem:[%s3152_s30 + $0x88] sm:$0xff]  ;;  %v1205_v0 = vld [vmem:[#allocation2 + $0x18] sm:$0xff] }
  0x44   : > { %1235 = vmatpush.msra.mxu0 %v1216_v22  ;;  %v1206_v60 = vld [vmem:[#allocation2 + $0x20] sm:$0xff]  ;;  %v710_v62 = vld [vmem:[%s3143_s18 + $0x88] sm:$0xff]  ;;  %v1204_v1 = vld [vmem:[#allocation2 + $0x10] sm:$0xff] }
  0x45   : > { %v737_v63 = vld [vmem:[%s3152_s30 + $0x60] sm:$0xff]  ;;  %1447 = vmatpush.msra.mxu1 %v1206_v60  ;;  %2621 = vmatpush.msra.mxu2 %v1206_v60  ;;  %v1203_v3 = vld [vmem:[#allocation2 + $0x8] sm:$0xff]  ;;  %v1177_v4 = vld [vmem:[%s3212_s24 + $0x38] sm:$0xff] }
  0x46   : > { %1236 = vmatpush.msra.mxu0 %v1215_v23  ;;  %2622 = vmatpush.msra.mxu3 %v1206_v60  ;;  %v712_v5 = vld [vmem:[%s3143_s18 + $0x98] sm:$0xff]  ;;  %v743_v6 = vld [vmem:[%s3152_s30 + $0x90] sm:$0xff]  ;;  %v1202_v7 = vld [vmem:[#allocation2] sm:$0xff] }
  0x47   : > { %774 = vperm.xlu2 %2731, %v697_v12   ;;  %899 = vperm.xlu1 %2730, %v728_v13   ;;  %v711_v8 = vld [vmem:[%s3143_s18 + $0x90] sm:$0xff]  ;;  %v1178_v10 = vld [vmem:[%s3212_s24 + $0x40] sm:$0xff]  ;;  %v744_v13 = vld [vmem:[%s3152_s30 + $0x98] sm:$0xff] }
  0x48   : > { %771 = vperm.xlu0 %2729, %v696_v14   ;;  %1237 = vmatpush.msra.mxu0 %v1214_v24  ;;  %v745_v11 = vld [vmem:[%s3152_s30 + $0xa0] sm:$0xff]  ;;  %v1179_v14 = vld [vmem:[%s3212_s24 + $0x48] sm:$0xff]  ;;  %v715_v16 = vld [vmem:[%s3143_s18 + $0xb0] sm:$0xff] }
  0x49   : > { %1448 = vmatpush.msra.mxu1 %v1205_v0  ;;  %2623 = vmatpush.msra.mxu2 %v1205_v0  ;;  %v713_v12 = vld [vmem:[%s3143_s18 + $0xa0] sm:$0xff]  ;;  %v746_v17 = vld [vmem:[%s3152_s30 + $0xa8] sm:$0xff]  ;;  %v1180_v22 = vld [vmem:[%s3212_s24 + $0x50] sm:$0xff] }
  0x4a   : > { %1238 = vmatpush.msra.mxu0 %v1213_v25  ;;  %2624 = vmatpush.msra.mxu3 %v1205_v0  ;;  %v714_v18 = vld [vmem:[%s3143_s18 + $0xa8] sm:$0xff]  ;;  %v748_v23 = vld [vmem:[%s3152_s30 + $0xb8] sm:$0xff]  ;;  %v747_v25 = vld [vmem:[%s3152_s30 + $0xb0] sm:$0xff] }
  0x4b   : > { %1449 = vmatpush.msra.mxu1 %v1204_v1  ;;  %2625 = vmatpush.msra.mxu2 %v1204_v1  ;;  %v716_v24 = vld [vmem:[%s3143_s18 + $0xb8] sm:$0xff]  ;;  %v722_v57 = vld [vmem:[%s3143_s18 + $0xe8] sm:$0xff]  ;;  %v755_v0 = vld [vmem:[%s3152_s30 + $0xf0] sm:$0xff] }
  0x4c   : > { %1239 = vmatpush.msra.mxu0 %v1212_v29  ;;  %2626 = vmatpush.msra.mxu3 %v1204_v1 }
  0x4d   : > { %1450 = vmatpush.msra.mxu1 %v1203_v3  ;;  %2627 = vmatpush.msra.mxu2 %v1203_v3 }
  0x4e   : > { %1240 = vmatpush.msra.mxu0 %v1211_v30  ;;  %2628 = vmatpush.msra.mxu3 %v1203_v3  ;;  %v1181_v30 = vld [vmem:[%s3212_s24 + $0x58] sm:$0xff] }
  0x4f   : > { %905 = vperm.xlu2 %2731, %v730_v19   ;;  %777 = vperm.xlu1 %2730, %v698_v20  }
  0x50   : > { %902 = vperm.xlu0 %2729, %v729_v21   ;;  %1241 = vmatpush.msra.mxu0 %v1210_v31  ;;  %v759_v21 = vlaneseq  ;;  %v718_v31 = vld [vmem:[%s3143_s18 + $0xc8] sm:$0xff] }
  0x51   : > { %1242 = vmatmul.f32.vlgmr.msra.gmra.mxu0 %v1170_v32  ;;  %1451 = vmatpush.msra.mxu1 %v1202_v7  ;;  %v749_v32 = vld [vmem:[%s3152_s30 + $0xc0] sm:$0xff] }
  0x52   : > { %2629 = vmatpush.msra.mxu2 %v1202_v7  ;;  %2630 = vmatpush.msra.mxu3 %v1202_v7 }
  0x57   : > { %783 = vperm.xlu2 %2731, %v700_v26   ;;  %908 = vperm.xlu1 %2730, %v731_v27   ;;  %v3273_v27 = vand.u32 127, %v759_v21 }
  0x58   : > { %780 = vperm.xlu0 %2729, %v699_v28  }
  0x59   : > { %1245 = vmatmul.f32.gmra.mxu0 %v1171_v36 }
  0x5f   : > { %914 = vperm.xlu2 %2731, %v733_v33   ;;  %786 = vperm.xlu1 %2730, %v701_v34   ;;  %v2952_v33 = vmov 0.0  }
  0x60   : > { %911 = vperm.xlu0 %2729, %v732_v35   ;;  %v717_v35 = vld [vmem:[%s3143_s18 + $0xc0] sm:$0xff] }
  0x61   : > { %1248 = vmatmul.f32.gmra.mxu0 %v1172_v40  ;;  %v751_v40 = vld [vmem:[%s3152_s30 + $0xd0] sm:$0xff] }
  0x67   : > { %789 = vperm.xlu2 %2731, %v702_v37   ;;  %929 = vperm.xlu1 %2730, %v738_v38  }
  0x68   : > { %801 = vperm.xlu0 %2729, %v706_v39   ;;  %v1182_v39 = vld [vmem:[%s3212_s24 + $0x60] sm:$0xff] }
  0x69   : > { %1251 = vmatmul.f32.gmra.mxu0 %v1173_v44 }
  0x6f   : > { %932 = vperm.xlu2 %2731, %v739_v41   ;;  %804 = vperm.xlu1 %2730, %v707_v42   ;;  %v719_v41 = vld [vmem:[%s3143_s18 + $0xd0] sm:$0xff] }
  0x70   : > { %917 = vperm.xlu0 %2729, %v734_v43   ;;  %v750_v43 = vld [vmem:[%s3152_s30 + $0xc8] sm:$0xff] }
  0x71   : > { %1254 = vmatmul.f32.gmra.mxu0 %v1174_v48  ;;  %v721_v48 = vld [vmem:[%s3143_s18 + $0xe0] sm:$0xff] }
  0x77   : > { %807 = vperm.xlu2 %2731, %v708_v45   ;;  %920 = vperm.xlu1 %2730, %v735_v46  }
  0x78   : > { %792 = vperm.xlu0 %2729, %v703_v47   ;;  %v1183_v47 = vld [vmem:[%s3212_s24 + $0x68] sm:$0xff] }
  0x79   : > { %1257 = vmatmul.f32.gmra.mxu0 %v1175_v52 }
  0x7f   : > { %923 = vperm.xlu2 %2731, %v736_v49   ;;  %795 = vperm.xlu1 %2730, %v704_v50   ;;  %v752_v49 = vld [vmem:[%s3152_s30 + $0xd8] sm:$0xff] }
  0x80   : > { %935 = vperm.xlu0 %2729, %v740_v51   ;;  %v720_v51 = vld [vmem:[%s3143_s18 + $0xd8] sm:$0xff] }
  0x81   : > { %1260 = vmatmul.f32.gmra.mxu0 %v1176_v59  ;;  %v753_v59 = vld [vmem:[%s3152_s30 + $0xe0] sm:$0xff] }
  0x87   : > { %798 = vperm.xlu2 %2731, %v705_v54   ;;  %938 = vperm.xlu1 %2730, %v741_v55   ;;  %v1184_v54 = vld [vmem:[%s3212_s24 + $0x70] sm:$0xff] }
  0x88   : > { %810 = vperm.xlu0 %2729, %v709_v56   ;;  %v754_v56 = vld [vmem:[%s3152_s30 + $0xe8] sm:$0xff] }
  0x89   : > { %1263 = vmatmul.f32.gmra.mxu0 %v1177_v4 }
  0x8f   : > { %941 = vperm.xlu2 %2731, %v742_v61   ;;  %813 = vperm.xlu1 %2730, %v710_v62   ;;  %v1185_v62 = vld [vmem:[%s3212_s24 + $0x78] sm:$0xff] }
  0x90   : > { %926 = vperm.xlu0 %2729, %v737_v63   ;;  %v724_v63 = vld [vmem:[%s3143_s18 + $0xf8] sm:$0xff] }
  0x91   : > { %v3248_v2 = vpop.permute.xlu2 %768  ;;  %1266 = vmatmul.f32.gmra.mxu0 %v1178_v10 }
  0x92   : > { %vm859_vm7 = vcmp.eq.s32.totalorder %v3273_v27, %v3248_v2  ;;  %v723_v2 = vld [vmem:[%s3143_s18 + $0xf0] sm:$0xff] }
  0x97   : > { %819 = vperm.xlu2 %2731, %v712_v5   ;;  %944 = vperm.xlu1 %2730, %v743_v6   ;;  %v1186_v6 = vld [vmem:[%s3212_s24 + $0x80] sm:$0xff] }
  0x98   : > { %816 = vperm.xlu0 %2729, %v711_v8  }
  0x99   : > { %v3254_v9 = vpop.permute.xlu2 %896  ;;  %1269 = vmatmul.f32.gmra.mxu0 %v1179_v14 }
  0x9a   : > { %vm987_vm8 = vcmp.eq.s32.totalorder %v3273_v27, %v3254_v9  ;;  %v756_v9 = vld [vmem:[%s3152_s30 + $0xf8] sm:$0xff] }
  0x9b   : > { %vm1019_vm9 = vmor %vm859_vm7, %vm987_vm8 }
  0x9c   : > { %v2511_v50 = vsel %vm1019_vm9, 1.0, %v2952_v33 }
  0x9f   : > { %950 = vperm.xlu2 %2731, %v745_v11   ;;  %822 = vperm.xlu1 %2730, %v713_v12  }
  0xa0   : > { %947 = vperm.xlu0 %2729, %v744_v13   ;;  %v1187_v13 = vld [vmem:[%s3212_s24 + $0x88] sm:$0xff] }
  0xa1   : > { %v3261_v15 = vpop.permute.xlu2 %774  ;;  %1272 = vmatmul.f32.gmra.mxu0 %v1180_v22 }
  0xa2   : > { %vm861_vm14 = vcmp.eq.s32.totalorder %v3273_v27, %v3261_v15 }
  0xa7   : > { %828 = vperm.xlu2 %2731, %v715_v16   ;;  %953 = vperm.xlu1 %2730, %v746_v17  }
  0xa8   : > { %825 = vperm.xlu0 %2729, %v714_v18  }
  0xa9   : > { %v766_v19 = vpop.permute.xlu1 %765  ;;  %v3270_v26 = vpop.permute.xlu2 %905  ;;  %1275 = vmatmul.f32.gmra.mxu0 %v1181_v30 }
  0xaa   : > { %v763_v20 = vpop.permute.xlu0 %762  ;;  %vm858_vm4 = vcmp.eq.s32.totalorder %v3273_v27, %v766_v19  ;;  %v1188_v19 = vld [vmem:[%s3212_s24 + $0x90] sm:$0xff] }
  0xab   : > { %vm857_vm0 = vcmp.eq.s32.totalorder %v3273_v27, %v763_v20 }
  0xaf   : > { %959 = vperm.xlu2 %2731, %v748_v23   ;;  %831 = vperm.xlu1 %2730, %v716_v24  }
  0xb0   : > { %956 = vperm.xlu0 %2729, %v747_v25   ;;  %v1189_v25 = vld [vmem:[%s3212_s24 + $0x98] sm:$0xff] }
  0xb1   : > { %v894_v28 = vpop.permute.xlu1 %893  ;;  %v3285_v36 = vpop.permute.xlu2 %783  ;;  %1278 = vmatmul.f32.gmra.mxu0 %v1182_v39 }
  0xb2   : > { %v891_v29 = vpop.permute.xlu0 %890  ;;  %vm986_vm5 = vcmp.eq.s32.totalorder %v3273_v27, %v894_v28 }
  0xb3   : > { %vm985_vm1 = vcmp.eq.s32.totalorder %v3273_v27, %v891_v29  ;;  %vm1018_vm6 = vmor %vm858_vm4, %vm986_vm5 }
  0xb4   : > { %vm1017_vm3 = vmor %vm857_vm0, %vm985_vm1  ;;  %v2510_v42 = vsel %vm1018_vm6, 1.0, %v2952_v33  ;;  %vm990_vm1 = vcmp.eq.s32.totalorder %v3273_v27, %v3270_v26 }
  0xb5   : > { %v2509_v34 = vsel %vm1017_vm3, 1.0, %v2952_v33 }
  0xb6   : > { %2557 = vmatmul.msk.f32.vlgmr.msra.gmra.mxu1 %vm1339_vm2, %v2509_v34  ;;  %v1190_v34 = vld [vmem:[%s3212_s24 + $0xa0] sm:$0xff] }
  0xb7   : > { %837 = vperm.xlu2 %2731, %v718_v31   ;;  %962 = vperm.xlu1 %2730, %v749_v32  }
  0xb8   : > { %834 = vperm.xlu0 %2729, %v717_v35   ;;  %v1664_v35 = vld [vmem:[%s4299_s8 + $0x78] sm:$0xff] }
  0xb9   : > { %v900_v37 = vpop.permute.xlu1 %899  ;;  %v3297_v45 = vpop.permute.xlu2 %914  ;;  %1281 = vmatmul.f32.gmra.mxu0 %v1183_v47  ;;  %1669 = vmatpush.msrb.mxu2 %v1664_v35  ;;  %v1661_v47 = vld [vmem:[%s4299_s8 + $0x60] sm:$0xff] }
  0xba   : > { %v772_v38 = vpop.permute.xlu0 %771  ;;  %vm988_vm10 = vcmp.eq.s32.totalorder %v3273_v27, %v900_v37  ;;  %v1194_v35 = vld [vmem:[%s3212_s24 + $0xc0] sm:$0xff] }
  0xbb   : > { %vm860_vm11 = vcmp.eq.s32.totalorder %v3273_v27, %v772_v38 }
  0xbc   : > { %vm1020_vm12 = vmor %vm860_vm11, %vm988_vm10 }
  0xbd   : > { %v2512_v58 = vsel %vm1020_vm12, 1.0, %v2952_v33 }
  0xbe   : > { %2558 = vmatmul.msk.f32.gmra.mxu1 %vm1339_vm2, %v2510_v42  ;;  %v1662_v42 = vld [vmem:[%s4299_s8 + $0x68] sm:$0xff] }
  0xbf   : > { %968 = vperm.xlu2 %2731, %v751_v40   ;;  %840 = vperm.xlu1 %2730, %v719_v41   ;;  %v1663_v40 = vld [vmem:[%s4299_s8 + $0x70] sm:$0xff] }
  0xc0   : > { %965 = vperm.xlu0 %2729, %v750_v43   ;;  %v1929_v41 = vld [vmem:[%s4303_s12 + $0x70] sm:$0xff]  ;;  %1670 = vmatpush.msrb.mxu2 %v1663_v40 }
  0xc1   : > { %v778_v44 = vpop.permute.xlu1 %777  ;;  %v3308_v55 = vpop.permute.xlu2 %789  ;;  %1284 = vmatmul.f32.gmra.mxu0 %v1184_v54  ;;  %v1659_v54 = vld [vmem:[%s4299_s8 + $0x50] sm:$0xff] }
  0xc2   : > { %v903_v46 = vpop.permute.xlu0 %902  ;;  %vm862_vm0 = vcmp.eq.s32.totalorder %v3273_v27, %v778_v44  ;;  %v1928_v44 = vld [vmem:[%s4303_s12 + $0x68] sm:$0xff]  ;;  %1671 = vmatpush.msrb.mxu2 %v1662_v42 }
  0xc3   : > { %vm989_vm13 = vcmp.eq.s32.totalorder %v3273_v27, %v903_v46  ;;  %vm1022_vm3 = vmor %vm862_vm0, %vm990_vm1  ;;  %vm993_vm1 = vcmp.eq.s32.totalorder %v3273_v27, %v3297_v45 }
  0xc4   : > { %vm1021_vm15 = vmor %vm861_vm14, %vm989_vm13  ;;  %v2514_v7 = vsel %vm1022_vm3, 1.0, %v2952_v33  ;;  %vm864_vm14 = vcmp.eq.s32.totalorder %v3273_v27, %v3285_v36  ;;  %v1930_v36 = vld [vmem:[%s4303_s12 + $0x78] sm:$0xff]  ;;  %1672 = vmatpush.msrb.mxu2 %v1661_v47 }
  0xc5   : > { %v2513_v1 = vsel %vm1021_vm15, 1.0, %v2952_v33  ;;  %1935 = vmatpush.msrb.mxu1 %v1930_v36 }
  0xc6   : > { %2559 = vmatmul.msk.f32.gmra.mxu1 %vm1339_vm2, %v2511_v50 }
  0xc7   : > { %846 = vperm.xlu2 %2731, %v721_v48   ;;  %971 = vperm.xlu1 %2730, %v752_v49   ;;  %v1927_v48 = vld [vmem:[%s4303_s12 + $0x60] sm:$0xff]  ;;  %v1191_v49 = vld [vmem:[%s3212_s24 + $0xa8] sm:$0xff] }
  0xc8   : > { %843 = vperm.xlu0 %2729, %v720_v51   ;;  %1936 = vmatpush.msrb.mxu1 %v1929_v41  ;;  %v1660_v51 = vld [vmem:[%s4299_s8 + $0x58] sm:$0xff]  ;;  %v1195_v41 = vld [vmem:[%s3212_s24 + $0xc8] sm:$0xff] }
  0xc9   : > { %v909_v52 = vpop.permute.xlu1 %908  ;;  %1287 = vmatmul.f32.gmra.mxu0 %v1185_v62  ;;  %v933_v3 = vpop.permute.xlu2 %932  ;;  %1673 = vmatpush.msrb.mxu2 %v1660_v51  ;;  %v1657_v62 = vld [vmem:[%s4299_s8 + $0x40] sm:$0xff] }
  0xca   : > { %v781_v53 = vpop.permute.xlu0 %780  ;;  %vm991_vm7 = vcmp.eq.s32.totalorder %v3273_v27, %v909_v52  ;;  %vm999_vm9 = vcmp.eq.s32.totalorder %v3273_v27, %v933_v3  ;;  %1937 = vmatpush.msrb.mxu1 %v1928_v44  ;;  %v1926_v52 = vld [vmem:[%s4303_s12 + $0x58] sm:$0xff] }
  0xcb   : > { %vm863_vm8 = vcmp.eq.s32.totalorder %v3273_v27, %v781_v53  ;;  %1674 = vmatpush.msrb.mxu2 %v1659_v54 }
  0xcc   : > { %vm1023_vm10 = vmor %vm863_vm8, %vm991_vm7  ;;  %vm866_vm8 = vcmp.eq.s32.totalorder %v3273_v27, %v3308_v55  ;;  %1938 = vmatpush.msrb.mxu1 %v1927_v48  ;;  %v1925_v55 = vld [vmem:[%s4303_s12 + $0x50] sm:$0xff] }
  0xcd   : > { %v2515_v15 = vsel %vm1023_vm10, 1.0, %v2952_v33  ;;  %v1196_v48 = vld [vmem:[%s3212_s24 + $0xd0] sm:$0xff] }
  0xce   : > { %2560 = vmatmul.msk.f32.gmra.mxu1 %vm1339_vm2, %v2512_v58  ;;  %v3350_v20 = vpop.f32.mrf.mxu0  ;;  %v1924_v58 = vld [vmem:[%s4303_s12 + $0x48] sm:$0xff] }
  0xcf   : > { %977 = vperm.xlu2 %2731, %v754_v56   ;;  %849 = vperm.xlu1 %2730, %v722_v57   ;;  %v1658_v57 = vld [vmem:[%s4299_s8 + $0x48] sm:$0xff] }
  0xd0   : > { %974 = vperm.xlu0 %2729, %v753_v59   ;;  %1939 = vmatpush.msrb.mxu1 %v1926_v52 }
  0xd1   : > { %v787_v60 = vpop.permute.xlu1 %786  ;;  %1290 = vmatmul.f32.gmra.mxu0 %v1186_v6  ;;  %v808_v10 = vpop.permute.xlu2 %807  ;;  %1675 = vmatpush.msrb.mxu2 %v1658_v57  ;;  %v1921_v6 = vld [vmem:[%s4303_s12 + $0x30] sm:$0xff] }
  0xd2   : > { %v912_v61 = vpop.permute.xlu0 %911  ;;  %vm865_vm0 = vcmp.eq.s32.totalorder %v3273_v27, %v787_v60  ;;  %1940 = vmatpush.msrb.mxu1 %v1925_v55 }
  0xd3   : > { %vm992_vm13 = vcmp.eq.s32.totalorder %v3273_v27, %v912_v61  ;;  %vm1025_vm3 = vmor %vm865_vm0, %vm993_vm1  ;;  %1676 = vmatpush.msrb.mxu2 %v1657_v62 }
  0xd4   : > { %vm1024_vm15 = vmor %vm864_vm14, %vm992_vm13  ;;  %v2517_v28 = vsel %vm1025_vm3, 1.0, %v2952_v33  ;;  %1941 = vmatpush.msrb.mxu1 %v1924_v58  ;;  %v1797_v58 = vld [vmem:[%s4301_s10 + $0x78] sm:$0xff] }
  0xd5   : > { %v2516_v22 = vsel %vm1024_vm15, 1.0, %v2952_v33  ;;  %1802 = vmatpush.msrb.mxu3 %v1797_v58 }
  0xd6   : > { %2561 = vmatmul.msk.f32.gmra.mxu1 %vm1339_vm2, %v2513_v1  ;;  %v3368_v30 = vpop.f32.mrf.mxu0  ;;  %v1656_v1 = vld [vmem:[%s4299_s8 + $0x38] sm:$0xff] }
  0xd7   : > { %855 = vperm.xlu2 %2731, %v724_v63   ;;  %980 = vperm.xlu1 %2730, %v755_v0   ;;  %v1923_v63 = vld [vmem:[%s4303_s12 + $0x40] sm:$0xff]  ;;  %v1192_v0 = vld [vmem:[%s3212_s24 + $0xb0] sm:$0xff] }
  0xd8   : > { %852 = vperm.xlu0 %2729, %v723_v2   ;;  %1942 = vmatpush.msrb.mxu1 %v1923_v63  ;;  %v1795_v63 = vld [vmem:[%s4301_s10 + $0x68] sm:$0xff] }
  0xd9   : > { %v930_v4 = vpop.permute.xlu1 %929  ;;  %1293 = vmatmul.f32.gmra.mxu0 %v1187_v13  ;;  %v3347_v17 = vpop.permute.xlu2 %923  ;;  %1677 = vmatpush.msrb.mxu2 %v1656_v1 }
  0xda   : > { %vm998_vm4 = vcmp.eq.s32.totalorder %v3273_v27, %v930_v4  ;;  %v802_v5 = vpop.permute.xlu0 %801  ;;  %v1922_v4 = vld [vmem:[%s4303_s12 + $0x38] sm:$0xff] }
  0xdb   : > { %vm870_vm5 = vcmp.eq.s32.totalorder %v3273_v27, %v802_v5  ;;  %v1655_v5 = vld [vmem:[%s4299_s8 + $0x30] sm:$0xff]  ;;  %1943 = vmatpush.msrb.mxu1 %v1922_v4 }
  0xdc   : > { %vm1030_vm6 = vmor %vm870_vm5, %vm998_vm4  ;;  %vm872_vm4 = vcmp.eq.s32.totalorder %v3273_v27, %v808_v10  ;;  %1678 = vmatpush.msrb.mxu2 %v1655_v5  ;;  %v1198_v5 = vld [vmem:[%s3212_s24 + $0xe0] sm:$0xff] }
  0xdd   : > { %v2522_v8 = vsel %vm1030_vm6, 1.0, %v2952_v33  ;;  %1944 = vmatpush.msrb.mxu1 %v1921_v6 }
  0xde   : > { %2562 = vmatmul.msk.f32.gmra.mxu1 %vm1339_vm2, %v2514_v7  ;;  %2570 = vmatmul.msk.f32.vlgmr.msra.gmra.mxu2 %vm1339_vm2, %v2522_v8  ;;  %v3397_v43 = vpop.f32.mrf.mxu0  ;;  %v1654_v7 = vld [vmem:[%s4299_s8 + $0x28] sm:$0xff] }
  0xdf   : > { %1679 = vmatpush.msrb.mxu2 %v1654_v7 }
  0xe0   : > { %983 = vperm.xlu0 %2729, %v756_v9   ;;  %v1920_v9 = vld [vmem:[%s4303_s12 + $0x28] sm:$0xff] }
  0xe1   : > { %v805_v11 = vpop.permute.xlu1 %804  ;;  %1296 = vmatmul.f32.gmra.mxu0 %v1188_v19  ;;  %v3362_v26 = vpop.permute.xlu2 %798  ;;  %1945 = vmatpush.msrb.mxu1 %v1920_v9  ;;  %v1918_v19 = vld [vmem:[%s4303_s12 + $0x18] sm:$0xff]  ;;  %v1792_v9 = vld [vmem:[%s4301_s10 + $0x50] sm:$0xff] }
  0xe2   : > { %vm871_vm11 = vcmp.eq.s32.totalorder %v3273_v27, %v805_v11  ;;  %v918_v12 = vpop.permute.xlu0 %917 }
  0xe3   : > { %vm1031_vm12 = vmor %vm871_vm11, %vm999_vm9  ;;  %vm994_vm7 = vcmp.eq.s32.totalorder %v3273_v27, %v918_v12  ;;  %v1653_v12 = vld [vmem:[%s4299_s8 + $0x20] sm:$0xff] }
  0xe4   : > { %v2523_v14 = vsel %vm1031_vm12, 1.0, %v2952_v33  ;;  %vm1026_vm9 = vmor %vm866_vm8, %vm994_vm7  ;;  %1680 = vmatpush.msrb.mxu2 %v1653_v12  ;;  %v1791_v12 = vld [vmem:[%s4301_s10 + $0x48] sm:$0xff] }
  0xe5   : > { %v2518_v37 = vsel %vm1026_vm9, 1.0, %v2952_v33 }
  0xe6   : > { %2563 = vmatmul.msk.f32.gmra.mxu1 %vm1339_vm2, %v2515_v15  ;;  %2571 = vmatmul.msk.f32.gmra.mxu2 %vm1339_vm2, %v2523_v14  ;;  %v3438_v61 = vpop.f32.mrf.mxu0  ;;  %v1919_v14 = vld [vmem:[%s4303_s12 + $0x20] sm:$0xff]  ;;  %v1193_v15 = vld [vmem:[%s3212_s24 + $0xb8] sm:$0xff] }
  0xe7   : > { %1946 = vmatpush.msrb.mxu1 %v1919_v14 }
  0xe9   : > { %v921_v16 = vpop.permute.xlu1 %920  ;;  %1299 = vmatmul.f32.gmra.mxu0 %v1189_v25  ;;  %v942_v39 = vpop.permute.xlu2 %941  ;;  %1947 = vmatpush.msrb.mxu1 %v1918_v19  ;;  %v1650_v25 = vld [vmem:[%s4299_s8 + $0x8] sm:$0xff] }
  0xea   : > { %v793_v18 = vpop.permute.xlu0 %792  ;;  %vm995_vm13 = vcmp.eq.s32.totalorder %v3273_v27, %v921_v16  ;;  %vm1002_vm15 = vcmp.eq.s32.totalorder %v3273_v27, %v942_v39  ;;  %v1199_v19 = vld [vmem:[%s3212_s24 + $0xe8] sm:$0xff] }
  0xeb   : > { %vm867_vm14 = vcmp.eq.s32.totalorder %v3273_v27, %v793_v18  ;;  %v1652_v18 = vld [vmem:[%s4299_s8 + $0x18] sm:$0xff] }
  0xec   : > { %vm1027_vm0 = vmor %vm867_vm14, %vm995_vm13  ;;  %1681 = vmatpush.msrb.mxu2 %v1652_v18 }
  0xed   : > { %v2519_v53 = vsel %vm1027_vm0, 1.0, %v2952_v33 }
  0xee   : > { %2564 = vmatmul.msk.f32.gmra.mxu1 %vm1339_vm2, %v2516_v22  ;;  %v3478_v13 = vpop.f32.mrf.mxu0  ;;  %v1651_v22 = vld [vmem:[%s4299_s8 + $0x10] sm:$0xff] }
  0xef   : > { %1682 = vmatpush.msrb.mxu2 %v1651_v22 }
  0xf1   : > { %v3357_v23 = vpop.permute.xlu1 %795  ;;  %1302 = vmatmul.f32.gmra.mxu0 %v1190_v34  ;;  %v820_v56 = vpop.permute.xlu2 %819  ;;  %1683 = vmatpush.msrb.mxu2 %v1650_v25  ;;  %v1788_v25 = vld [vmem:[%s4301_s10 + $0x30] sm:$0xff] }
  0xf2   : > { %v936_v24 = vpop.permute.xlu0 %935  ;;  %vm876_vm13 = vcmp.eq.s32.totalorder %v3273_v27, %v820_v56  ;;  %v1197_v56 = vld [vmem:[%s3212_s24 + $0xd8] sm:$0xff] }
  0xf3   : > { %vm1000_vm5 = vcmp.eq.s32.totalorder %v3273_v27, %v936_v24 }
  0xf4   : > { %vm1032_vm6 = vmor %vm872_vm4, %vm1000_vm5  ;;  %vm868_vm4 = vcmp.eq.s32.totalorder %v3273_v27, %v3357_v23  ;;  %vm996_vm5 = vcmp.eq.s32.totalorder %v3273_v27, %v3347_v17  ;;  %v1917_v23 = vld [vmem:[%s4303_s12 + $0x10] sm:$0xff] }
  0xf5   : > { %v2524_v29 = vsel %vm1032_vm6, 1.0, %v2952_v33  ;;  %vm1028_vm6 = vmor %vm868_vm4, %vm996_vm5  ;;  %1948 = vmatpush.msrb.mxu1 %v1917_v23 }
  0xf6   : > { %2565 = vmatmul.msk.f32.gmra.mxu1 %vm1339_vm2, %v2517_v28  ;;  %2572 = vmatmul.msk.f32.gmra.mxu2 %vm1339_vm2, %v2524_v29  ;;  %v2520_v2 = vsel %vm1028_vm6, 1.0, %v2952_v33  ;;  %v1916_v28 = vld [vmem:[%s4303_s12 + $0x8] sm:$0xff]  ;;  %v3517_v36 = vpop.f32.mrf.mxu0 }
  0xf7   : > { %1949 = vmatpush.msrb.mxu1 %v1916_v28  ;;  %v1787_v28 = vld [vmem:[%s4301_s10 + $0x28] sm:$0xff] }
  0xf9   : > { %v939_v31 = vpop.permute.xlu1 %938  ;;  %1305 = vmatmul.f32.gmra.mxu0 %v1191_v49  ;;  %v951_v10 = vpop.permute.xlu2 %950 }
  0xfa   : > { %vm1001_vm10 = vcmp.eq.s32.totalorder %v3273_v27, %v939_v31  ;;  %v811_v32 = vpop.permute.xlu0 %810  ;;  %v1649_v31 = vld [vmem:[%s4299_s8] sm:$0xff] }
  0xfb   : > { %vm873_vm11 = vcmp.eq.s32.totalorder %v3273_v27, %v811_v32  ;;  %v1915_v32 = vld [vmem:[%s4303_s12] sm:$0xff]  ;;  %1684 = vmatpush.msrb.mxu2 %v1649_v31 }
  0xfc   : > { %vm1033_vm12 = vmor %vm873_vm11, %vm1001_vm10  ;;  %vm869_vm11 = vcmp.eq.s32.totalorder %v3273_v27, %v3362_v26  ;;  %1950 = vmatpush.msrb.mxu1 %v1915_v32 }
  0xfd   : > { %v2525_v38 = vsel %vm1033_vm12, 1.0, %v2952_v33 }
  0xfe   : > { %2566 = vmatmul.msk.f32.gmra.mxu1 %vm1339_vm2, %v2518_v37  ;;  %2573 = vmatmul.msk.f32.gmra.mxu2 %vm1339_vm2, %v2525_v38  ;;  %v3529_v44 = vpop.f32.mrf.mxu0 }
 0x101   : > { %v814_v45 = vpop.permute.xlu1 %813  ;;  %1308 = vmatmul.f32.gmra.mxu0 %v1192_v0  ;;  %v829_v29 = vpop.permute.xlu2 %828 }
 0x102   : > { %vm874_vm1 = vcmp.eq.s32.totalorder %v3273_v27, %v814_v45  ;;  %v927_v46 = vpop.permute.xlu0 %926 }
 0x103   : > { %vm1034_vm3 = vmor %vm874_vm1, %vm1002_vm15  ;;  %vm997_vm10 = vcmp.eq.s32.totalorder %v3273_v27, %v927_v46  ;;  %vm1005_vm1 = vcmp.eq.s32.totalorder %v3273_v27, %v951_v10 }
 0x104   : > { %v2526_v50 = vsel %vm1034_vm3, 1.0, %v2952_v33  ;;  %vm1029_vm12 = vmor %vm869_vm11, %vm997_vm10 }
 0x105   : > { %v2521_v16 = vsel %vm1029_vm12, 1.0, %v2952_v33 }
 0x106   : > { %2567 = vmatmul.msk.f32.gmra.mxu1 %vm1339_vm2, %v2519_v53  ;;  %2574 = vmatmul.msk.f32.gmra.mxu2 %vm1339_vm2, %v2526_v50  ;;  %v3537_v49 = vpop.f32.mrf.mxu0  ;;  %v3539_v50 = vld [vmem:[#allocation5] ss:$0 sm:$0xff] }
 0x109   : > { %v945_v59 = vpop.permute.xlu1 %944  ;;  %1311 = vmatmul.f32.gmra.mxu0 %v1193_v15  ;;  %v960_v42 = vpop.permute.xlu2 %959 }
 0x10a   : > { %vm1003_vm7 = vcmp.eq.s32.totalorder %v3273_v27, %v945_v59  ;;  %v817_v60 = vpop.permute.xlu0 %816  ;;  %vm1008_vm11 = vcmp.eq.s32.totalorder %v3273_v27, %v960_v42  ;;  %v1784_v42 = vld [vmem:[%s4301_s10 + $0x10] sm:$0xff] }
 0x10b   : > { %vm875_vm8 = vcmp.eq.s32.totalorder %v3273_v27, %v817_v60 }
 0x10c   : > { %vm1035_vm9 = vmor %vm875_vm8, %vm1003_vm7  ;;  %vm879_vm7 = vcmp.eq.s32.totalorder %v3273_v27, %v829_v29 }
 0x10d   : > { %v2527_v3 = vsel %vm1035_vm9, 1.0, %v2952_v33 }
 0x10e   : > { %2568 = vmatmul.msk.f32.gmra.mxu1 %vm1339_vm2, %v2520_v2  ;;  %2575 = vmatmul.msk.f32.gmra.mxu2 %vm1339_vm2, %v2527_v3  ;;  %v3559_v1 = vpop.f32.mrf.mxu0  ;;  %v1794_v3 = vld [vmem:[%s4301_s10 + $0x60] sm:$0xff] }
 0x111   : > { %v823_v8 = vpop.permute.xlu1 %822  ;;  %1314 = vmatmul.f32.gmra.mxu0 %v1194_v35  ;;  %v838_v52 = vpop.permute.xlu2 %837  ;;  %v1786_v35 = vld [vmem:[%s4301_s10 + $0x20] sm:$0xff] }
 0x112   : > { %v948_v11 = vpop.permute.xlu0 %947  ;;  %vm877_vm0 = vcmp.eq.s32.totalorder %v3273_v27, %v823_v8 }
 0x113   : > { %vm1004_vm14 = vcmp.eq.s32.totalorder %v3273_v27, %v948_v11  ;;  %vm1037_vm3 = vmor %vm877_vm0, %vm1005_vm1  ;;  %vm882_vm1 = vcmp.eq.s32.totalorder %v3273_v27, %v838_v52  ;;  %v1782_v52 = vld [vmem:[%s4301_s10] sm:$0xff] }
 0x114   : > { %vm1036_vm15 = vmor %vm876_vm13, %vm1004_vm14  ;;  %v2529_v34 = vsel %vm1037_vm3, 1.0, %v2952_v33 }
 0x115   : > { %v2528_v17 = vsel %vm1036_vm15, 1.0, %v2952_v33 }
 0x116   : > { %2569 = vmatmul.msk.f32.gmra.mxu1 %vm1339_vm2, %v2521_v16  ;;  %2576 = vmatmul.msk.f32.gmra.mxu2 %vm1339_vm2, %v2528_v17  ;;  %v1790_v17 = vld [vmem:[%s4301_s10 + $0x40] sm:$0xff]  ;;  %v3592_v22 = vpop.f32.mrf.mxu0 }
 0x119   : > { %v954_v24 = vpop.permute.xlu1 %953  ;;  %1317 = vmatmul.f32.gmra.mxu0 %v1195_v41  ;;  %v969_v6 = vpop.permute.xlu2 %968 }
 0x11a   : > { %v826_v26 = vpop.permute.xlu0 %825  ;;  %vm1006_vm4 = vcmp.eq.s32.totalorder %v3273_v27, %v954_v24 }
 0x11b   : > { %vm878_vm5 = vcmp.eq.s32.totalorder %v3273_v27, %v826_v26 }
 0x11c   : > { %vm1038_vm6 = vmor %vm878_vm5, %vm1006_vm4  ;;  %vm1011_vm5 = vcmp.eq.s32.totalorder %v3273_v27, %v969_v6 }
 0x11d   : > { %v2530_v39 = vsel %vm1038_vm6, 1.0, %v2952_v33 }
 0x11e   : > { %2577 = vmatmul.msk.f32.gmra.mxu2 %vm1339_vm2, %v2529_v34 }
 0x121   : > { %v832_v37 = vpop.permute.xlu1 %831  ;;  %1320 = vmatmul.f32.gmra.mxu0 %v1196_v48  ;;  %v847_v31 = vpop.permute.xlu2 %846 }
 0x122   : > { %v957_v38 = vpop.permute.xlu0 %956  ;;  %vm880_vm10 = vcmp.eq.s32.totalorder %v3273_v27, %v832_v37 }
 0x123   : > { %vm1007_vm8 = vcmp.eq.s32.totalorder %v3273_v27, %v957_v38  ;;  %vm1040_vm12 = vmor %vm880_vm10, %vm1008_vm11  ;;  %v1200_v38 = vld [vmem:[%s3212_s24 + $0xf0] sm:$0xff]  ;;  %vm885_vm11 = vcmp.eq.s32.totalorder %v3273_v27, %v847_v31 }
 0x124   : > { %vm1039_vm9 = vmor %vm879_vm7, %vm1007_vm8  ;;  %v2532_v47 = vsel %vm1040_vm12, 1.0, %v2952_v33 }
 0x125   : > { %v2531_v40 = vsel %vm1039_vm9, 1.0, %v2952_v33 }
 0x126   : > { %2578 = vmatmul.msk.f32.gmra.mxu2 %vm1339_vm2, %v2530_v39  ;;  %2579 = vmatmul.msk.f32.vlgmr.msra.gmra.mxu3 %vm1339_vm2, %v2531_v40  ;;  %v3623_v40 = vpop.f32.mrf.mxu0 }
 0x129   : > { %v963_v46 = vpop.permute.xlu1 %962  ;;  %1323 = vmatmul.f32.gmra.mxu0 %v1197_v56 }
 0x12a   : > { %v835_v45 = vpop.permute.xlu0 %834  ;;  %vm1009_vm13 = vcmp.eq.s32.totalorder %v3273_v27, %v963_v46 }
 0x12b   : > { %vm881_vm14 = vcmp.eq.s32.totalorder %v3273_v27, %v835_v45 }
 0x12c   : > { %vm1041_vm15 = vmor %vm881_vm14, %vm1009_vm13 }
 0x12d   : > { %v2533_v55 = vsel %vm1041_vm15, 1.0, %v2952_v33 }
 0x12e   : > { %2580 = vmatmul.msk.f32.gmra.mxu3 %vm1339_vm2, %v2532_v47  ;;  %v1783_v47 = vld [vmem:[%s4301_s10 + $0x8] sm:$0xff]  ;;  %v3646_v58 = vpop.f32.mrf.mxu0 }
 0x131   : > { %v841_v60 = vpop.permute.xlu1 %840  ;;  %1326 = vmatmul.f32.gmra.mxu0 %v1198_v5 }
 0x132   : > { %v966_v53 = vpop.permute.xlu0 %965  ;;  %vm883_vm4 = vcmp.eq.s32.totalorder %v3273_v27, %v841_v60 }
 0x133   : > { %v1453_v51 = vpop.f32.mrf.mxu1  ;;  %vm1010_vm0 = vcmp.eq.s32.totalorder %v3273_v27, %v966_v53  ;;  %vm1043_vm6 = vmor %vm883_vm4, %vm1011_vm5 }
 0x134   : > { %v1454_v54 = vadd.f32 %v1453_v51, %v3350_v20  ;;  %v1796_v20 = vld [vmem:[%s4301_s10 + $0x70] sm:$0xff]  ;;  %vm1042_vm3 = vmor %vm882_vm1, %vm1010_vm0  ;;  %v2535_v18 = vsel %vm1043_vm6, 1.0, %v2952_v33 }
 0x135   : > { %1803 = vmatpush.msrb.mxu3 %v1796_v20  ;;  %v2534_v4 = vsel %vm1042_vm3, 1.0, %v2952_v33 }
 0x136   : > { %v1553_v57 = vadd.f32 %v3539_v50, %v1454_v54  ;;  %2581 = vmatmul.msk.f32.gmra.mxu3 %vm1339_vm2, %v2533_v55  ;;  %v1201_v54 = vld [vmem:[%s3212_s24 + $0xf8] sm:$0xff]  ;;  %v978_v55 = vpop.permute.xlu2 %977  ;;  %v3660_v6 = vpop.f32.mrf.mxu0  ;;  %s2614_s24 = sshll.u32 %s2936_s21, 8 }
 0x137   : > { %1804 = vmatpush.msrb.mxu3 %v1795_v63  ;;  %vm1014_vm14 = vcmp.eq.s32.totalorder %v3273_v27, %v978_v55  ;;  %s2307_s26 = scalar_lea.hbm %s4340_s27, %s2614_s24 }
 0x138   : > { %v1585_v59 = vmul.f32 0.01, %v1553_v57  ;;  %s2310_s22 = sshll.u32 %s2307_s26, 4  ;;  %s2311_s22 = int_to_ptr.hbm [resolvable:$true] %s2310_s22 }
 0x139   : > { %1805 = vmatpush.msrb.mxu3 %v1794_v3  ;;  %v972_v15 = vpop.permute.xlu1 %971  ;;  %1329 = vmatmul.f32.gmra.mxu0 %v1199_v19 }
 0x13a   : > { %v3554_v62 = vmax.f32 %v1553_v57, %v1585_v59  ;;  %v844_v10 = vpop.permute.xlu0 %843  ;;  %vm1012_vm7 = vcmp.eq.s32.totalorder %v3273_v27, %v972_v15 }
 0x13b   : > { %v1456_v0 = vpop.f32.mrf.mxu1  ;;  %vm884_vm8 = vcmp.eq.s32.totalorder %v3273_v27, %v844_v10 }
 0x13c   : > { %v1457_v2 = vadd.f32 %v1456_v0, %v3368_v30  ;;  %1685 = vmatmul.f32.vlgmr.msrb.gmra.mxu2 %v3554_v62  ;;  %1951 = vmatmul.f32.vlgmr.msrb.gmra.mxu1 %v3554_v62  ;;  %v1793_v30 = vld [vmem:[%s4301_s10 + $0x58] sm:$0xff]  ;;  %vm1044_vm9 = vmor %vm884_vm8, %vm1012_vm7 }
 0x13d   : > { %1806 = vmatpush.msrb.mxu3 %v1793_v30  ;;  %v2536_v37 = vsel %vm1044_vm9, 1.0, %v2952_v33 }
 0x13e   : > { %v1554_v7 = vadd.f32 %v3539_v50, %v1457_v2  ;;  %2582 = vmatmul.msk.f32.gmra.mxu3 %vm1339_vm2, %v2534_v4 }
 0x13f   : > { %1807 = vmatpush.msrb.mxu3 %v1792_v9 }
 0x140   : > { %v1586_v8 = vmul.f32 0.01, %v1554_v7 }
 0x141   : > { %1808 = vmatpush.msrb.mxu3 %v1791_v12  ;;  %1332 = vmatmul.f32.gmra.mxu0 %v1200_v38  ;;  %v850_v45 = vpop.permute.xlu1 %849 }
 0x142   : > { %v3579_v11 = vmax.f32 %v1554_v7, %v1586_v8  ;;  %v975_v32 = vpop.permute.xlu0 %974  ;;  %vm886_vm13 = vcmp.eq.s32.totalorder %v3273_v27, %v850_v45  ;;  %v856_v8 = vpop.permute.xlu2 %855 }
 0x143   : > { %v1459_v14 = vpop.f32.mrf.mxu1  ;;  %1809 = vmatpush.msrb.mxu3 %v1790_v17  ;;  %vm1013_vm10 = vcmp.eq.s32.totalorder %v3273_v27, %v975_v32  ;;  %vm1046_vm15 = vmor %vm886_vm13, %vm1014_vm14  ;;  %vm888_vm5 = vcmp.eq.s32.totalorder %v3273_v27, %v856_v8  ;;  %v1282_v17 = vpop.f32.mrf.mxu0 }
 0x144   : > { %v1460_v16 = vadd.f32 %v1459_v14, %v3397_v43  ;;  %1688 = vmatmul.f32.gmra.mxu2 %v3579_v11  ;;  %1954 = vmatmul.f32.gmra.mxu1 %v3579_v11  ;;  %v1789_v43 = vld [vmem:[%s4301_s10 + $0x38] sm:$0xff]  ;;  %vm1045_vm12 = vmor %vm885_vm11, %vm1013_vm10  ;;  %v2538_v0 = vsel %vm1046_vm15, 1.0, %v2952_v33 }
 0x145   : > { %1810 = vmatpush.msrb.mxu3 %v1789_v43  ;;  %v2537_v53 = vsel %vm1045_vm12, 1.0, %v2952_v33 }
 0x146   : > { %v1555_v23 = vadd.f32 %v3539_v50, %v1460_v16  ;;  %2583 = vmatmul.msk.f32.gmra.mxu3 %vm1339_vm2, %v2535_v18 }
 0x147   : > { %1811 = vmatpush.msrb.mxu3 %v1788_v25 }
 0x148   : > { %v1587_v24 = vmul.f32 0.01, %v1555_v23 }
 0x149   : > { %1812 = vmatpush.msrb.mxu3 %v1787_v28  ;;  %1335 = vmatmul.f32.gmra.mxu0 %v1201_v54  ;;  %v981_v60 = vpop.permute.xlu1 %980 }
 0x14a   : > { %v3604_v26 = vmax.f32 %v1555_v23, %v1587_v24  ;;  %v853_v57 = vpop.permute.xlu0 %852  ;;  %vm1015_vm0 = vcmp.eq.s32.totalorder %v3273_v27, %v981_v60 }
 0x14b   : > { %v1462_v29 = vpop.f32.mrf.mxu1  ;;  %1813 = vmatpush.msrb.mxu3 %v1786_v35  ;;  %vm887_vm1 = vcmp.eq.s32.totalorder %v3273_v27, %v853_v57 }
 0x14c   : > { %v1463_v34 = vadd.f32 %v1462_v29, %v3438_v61  ;;  %1691 = vmatmul.f32.gmra.mxu2 %v3604_v26  ;;  %1957 = vmatmul.f32.gmra.mxu1 %v3604_v26  ;;  %v1785_v61 = vld [vmem:[%s4301_s10 + $0x18] sm:$0xff]  ;;  %vm1047_vm3 = vmor %vm887_vm1, %vm1015_vm0 }
 0x14d   : > { %1814 = vmatpush.msrb.mxu3 %v1785_v61  ;;  %v2539_v30 = vsel %vm1047_vm3, 1.0, %v2952_v33 }
 0x14e   : > { %v1556_v39 = vadd.f32 %v3539_v50, %v1463_v34  ;;  %2584 = vmatmul.msk.f32.gmra.mxu3 %vm1339_vm2, %v2536_v37 }
 0x14f   : > { %1815 = vmatpush.msrb.mxu3 %v1784_v42 }
 0x150   : > { %v1588_v41 = vmul.f32 0.01, %v1556_v39 }
 0x151   : > { %1816 = vmatpush.msrb.mxu3 %v1783_v47 }
 0x152   : > { %v3629_v46 = vmax.f32 %v1556_v39, %v1588_v41 }
 0x153   : > { %v1465_v48 = vpop.f32.mrf.mxu1  ;;  %1817 = vmatpush.msrb.mxu3 %v1782_v52 }
 0x154   : > { %v1466_v51 = vadd.f32 %v1465_v48, %v3478_v13  ;;  %1694 = vmatmul.f32.gmra.mxu2 %v3629_v46  ;;  %1960 = vmatmul.f32.gmra.mxu1 %v3629_v46 }
 0x156   : > { %v1557_v56 = vadd.f32 %v3539_v50, %v1466_v51  ;;  %2585 = vmatmul.msk.f32.gmra.mxu3 %vm1339_vm2, %v2537_v53 }
 0x158   : > { %v1589_v13 = vmul.f32 0.01, %v1557_v56 }
 0x15a   : > { %v3648_v59 = vmax.f32 %v1557_v56, %v1589_v13 }
 0x15b   : > { %v1468_v20 = vpop.f32.mrf.mxu1 }
 0x15c   : > { %v1469_v63 = vadd.f32 %v1468_v20, %v3517_v36  ;;  %1697 = vmatmul.f32.gmra.mxu2 %v3648_v59  ;;  %1963 = vmatmul.f32.gmra.mxu1 %v3648_v59  ;;  %v984_v36 = vpop.permute.xlu0 %983 }
 0x15d   : > { %vm1016_vm4 = vcmp.eq.s32.totalorder %v3273_v27, %v984_v36 }
 0x15e   : > { %v1558_v2 = vadd.f32 %v3539_v50, %v1469_v63  ;;  %2586 = vmatmul.msk.f32.gmra.mxu3 %vm1339_vm2, %v2538_v0  ;;  %vm1048_vm6 = vmor %vm888_vm5, %vm1016_vm4 }
 0x15f   : > { %v2540_v16 = vsel %vm1048_vm6, 1.0, %v2952_v33  ;;  %v1285_v33 = vpop.f32.mrf.mxu0 }
 0x160   : > { %v1590_v3 = vmul.f32 0.01, %v1558_v2 }
 0x161   : > { %v1492_v12 = vpop.f32.mrf.mxu2 }
 0x162   : > { %v3658_v4 = vmax.f32 %v1558_v2, %v1590_v3  ;;  %v1493_v53 = vadd.f32 %v1492_v12, %v1282_v17 }
 0x163   : > { %v1471_v5 = vpop.f32.mrf.mxu1 }
 0x164   : > { %v1472_v7 = vadd.f32 %v1471_v5, %v3529_v44  ;;  %1700 = vmatmul.f32.gmra.mxu2 %v3658_v4  ;;  %1966 = vmatmul.f32.gmra.mxu1 %v3658_v4 }
 0x166   : > { %v1559_v9 = vadd.f32 %v3539_v50, %v1472_v7  ;;  %2587 = vmatmul.msk.f32.gmra.mxu3 %vm1339_vm2, %v2539_v30 }
 0x167   : > { %v1288_v35 = vpop.f32.mrf.mxu0 }
 0x168   : > { %v1591_v10 = vmul.f32 0.01, %v1559_v9 }
 0x169   : > { %v1495_v23 = vpop.f32.mrf.mxu2 }
 0x16a   : > { %v3670_v14 = vmax.f32 %v1559_v9, %v1591_v10  ;;  %v1496_v20 = vadd.f32 %v1495_v23, %v1285_v33 }
 0x16b   : > { %v1474_v44 = vpop.f32.mrf.mxu1 }
 0x16c   : > { %v1475_v15 = vadd.f32 %v1474_v44, %v3537_v49  ;;  %1703 = vmatmul.f32.gmra.mxu2 %v3670_v14  ;;  %1969 = vmatmul.f32.gmra.mxu1 %v3670_v14  ;;  %v1567_v63 = vadd.f32 %v3539_v50, %v1496_v20 }
 0x16e   : > { %v1560_v18 = vadd.f32 %v3539_v50, %v1475_v15  ;;  %2588 = vmatmul.msk.f32.gmra.mxu3 %vm1339_vm2, %v2540_v16  ;;  %v1599_v2 = vmul.f32 0.01, %v1567_v63 }
 0x16f   : > { %v1291_v42 = vpop.f32.mrf.mxu0 }
 0x170   : > { %v1592_v19 = vmul.f32 0.01, %v1560_v18 }
 0x172   : > { %v3678_v27 = vmax.f32 %v1560_v18, %v1592_v19 }
 0x173   : > { %v1477_v43 = vpop.f32.mrf.mxu1 }
 0x174   : > { %v1478_v24 = vadd.f32 %v1477_v43, %v3559_v1  ;;  %1706 = vmatmul.f32.gmra.mxu2 %v3678_v27  ;;  %1972 = vmatmul.f32.gmra.mxu1 %v3678_v27 }
 0x176   : > { %v1561_v49 = vadd.f32 %v3539_v50, %v1478_v24  ;;  %1818 = vmatmul.f32.vlgmr.msrb.gmra.mxu3 %v3554_v62 }
 0x177   : > { %v1294_v54 = vpop.f32.mrf.mxu0 }
 0x178   : > { %v1593_v25 = vmul.f32 0.01, %v1561_v49 }
 0x179   : > { %v1498_v29 = vpop.f32.mrf.mxu2 }
 0x17a   : > { %v3685_v28 = vmax.f32 %v1561_v49, %v1593_v25  ;;  %v1499_v3 = vadd.f32 %v1498_v29, %v1288_v35 }
 0x17b   : > { %v1480_v31 = vpop.f32.mrf.mxu1 }
 0x17c   : > { %v1481_v32 = vadd.f32 %v1480_v31, %v3592_v22  ;;  %1709 = vmatmul.f32.gmra.mxu2 %v3685_v28  ;;  %1975 = vmatmul.f32.gmra.mxu1 %v3685_v28  ;;  %v1568_v36 = vadd.f32 %v3539_v50, %v1499_v3 }
 0x17e   : > { %v1562_v1 = vadd.f32 %v3539_v50, %v1481_v32  ;;  %1821 = vmatmul.f32.gmra.mxu3 %v3579_v11  ;;  %v1600_v30 = vmul.f32 0.01, %v1568_v36 }
 0x17f   : > { %v1297_v60 = vpop.f32.mrf.mxu0 }
 0x180   : > { %v1594_v34 = vmul.f32 0.01, %v1562_v1  ;;  %v3736_v12 = vmax.f32 %v1568_v36, %v1600_v30 }
 0x181   : > { %v1501_v22 = vpop.f32.mrf.mxu2 }
 0x182   : > { %v3692_v37 = vmax.f32 %v1562_v1, %v1594_v34  ;;  %v1502_v8 = vadd.f32 %v1501_v22, %v1291_v42 }
 0x183   : > { %v1483_v62 = vpop.f32.mrf.mxu1 }
 0x184   : > { %v1484_v38 = vadd.f32 %v1483_v62, %v3623_v40  ;;  %1712 = vmatmul.f32.gmra.mxu2 %v3692_v37  ;;  %1978 = vmatmul.f32.gmra.mxu1 %v3692_v37  ;;  %v1569_v10 = vadd.f32 %v3539_v50, %v1502_v8 }
 0x186   : > { %v1563_v39 = vadd.f32 %v3539_v50, %v1484_v38  ;;  %1824 = vmatmul.f32.gmra.mxu3 %v3604_v26  ;;  %v1601_v44 = vmul.f32 0.01, %v1569_v10 }
 0x188   : > { %v1595_v61 = vmul.f32 0.01, %v1563_v39 }
 0x189   : > { %v1504_v47 = vpop.f32.mrf.mxu2 }
 0x18a   : > { %v3699_v41 = vmax.f32 %v1563_v39, %v1595_v61  ;;  %v1505_v15 = vadd.f32 %v1504_v47, %v1294_v54 }
 0x18b   : > { %v1486_v11 = vpop.f32.mrf.mxu1 }
 0x18c   : > { %v1487_v45 = vadd.f32 %v1486_v11, %v3646_v58  ;;  %1715 = vmatmul.f32.gmra.mxu2 %v3699_v41  ;;  %1981 = vmatmul.f32.gmra.mxu1 %v3699_v41  ;;  %v1570_v19 = vadd.f32 %v3539_v50, %v1505_v15 }
 0x18e   : > { %v1564_v40 = vadd.f32 %v3539_v50, %v1487_v45  ;;  %1827 = vmatmul.f32.gmra.mxu3 %v3629_v46  ;;  %v1566_v46 = vadd.f32 %v3539_v50, %v1493_v53  ;;  %v1602_v23 = vmul.f32 0.01, %v1570_v19 }
 0x190   : > { %v1596_v48 = vmul.f32 0.01, %v1564_v40  ;;  %v1598_v58 = vmul.f32 0.01, %v1566_v46  ;;  %v3758_v29 = vmax.f32 %v1570_v19, %v1602_v23 }
 0x191   : > { %v1507_v13 = vpop.f32.mrf.mxu2 }
 0x192   : > { %v3706_v51 = vmax.f32 %v1564_v40, %v1596_v48  ;;  %v3720_v0 = vmax.f32 %v1566_v46, %v1598_v58  ;;  %v1508_v43 = vadd.f32 %v1507_v13, %v1297_v60 }
 0x193   : > { %v1489_v26 = vpop.f32.mrf.mxu1 }
 0x194   : > { %v1490_v52 = vadd.f32 %v1489_v26, %v3660_v6  ;;  %1718 = vmatmul.f32.gmra.mxu2 %v3706_v51  ;;  %1984 = vmatmul.f32.gmra.mxu1 %v3706_v51  ;;  %v1300_v6 = vpop.f32.mrf.mxu0 }
 0x196   : > { %v1565_v55 = vadd.f32 %v3539_v50, %v1490_v52  ;;  %1830 = vmatmul.f32.gmra.mxu3 %v3648_v59 }
 0x198   : > { %v1597_v56 = vmul.f32 0.01, %v1565_v55 }
 0x199   : > { %v1510_v59 = vpop.f32.mrf.mxu2 }
 0x19a   : > { %v3714_v57 = vmax.f32 %v1565_v55, %v1597_v56  ;;  %v1511_v32 = vadd.f32 %v1510_v59, %v1300_v6 }
 0x19c   : > { %1721 = vmatmul.f32.gmra.mxu2 %v3714_v57  ;;  %1987 = vmatmul.f32.gmra.mxu1 %v3714_v57  ;;  %v1572_v62 = vadd.f32 %v3539_v50, %v1511_v32 }
 0x19e   : > { %1833 = vmatmul.f32.gmra.mxu3 %v3658_v4  ;;  %v3728_v4 = vmax.f32 %v1567_v63, %v1599_v2  ;;  %v1604_v22 = vmul.f32 0.01, %v1572_v62 }
 0x1a0   : > { %v3782_v40 = vmax.f32 %v1572_v62, %v1604_v22 }
 0x1a1   : > { %v1513_v7 = vpop.f32.mrf.mxu2 }
 0x1a4   : > { %1724 = vmatmul.f32.gmra.mxu2 %v3720_v0  ;;  %1990 = vmatmul.f32.gmra.mxu1 %v3720_v0 }
 0x1a6   : > { %1836 = vmatmul.f32.gmra.mxu3 %v3670_v14  ;;  %v1303_v14 = vpop.f32.mrf.mxu0 }
 0x1a7   : > { %v1514_v39 = vadd.f32 %v1513_v7, %v1303_v14 }
 0x1a9   : > { %v3725_v5 = vpop.f32.mrf.mxu3  ;;  %v1516_v16 = vpop.f32.mrf.mxu2  ;;  %v1573_v42 = vadd.f32 %v3539_v50, %v1514_v39 }
 0x1ab   : > { %v1605_v47 = vmul.f32 0.01, %v1573_v42 }
 0x1ac   : > { %1727 = vmatmul.f32.gmra.mxu2 %v3728_v4  ;;  %1993 = vmatmul.f32.gmra.mxu1 %v3728_v4 }
 0x1ad   : > { %v3794_v54 = vmax.f32 %v1573_v42, %v1605_v47 }
 0x1ae   : > { %1839 = vmatmul.f32.gmra.mxu3 %v3678_v27  ;;  %v3746_v27 = vmax.f32 %v1569_v10, %v1601_v44  ;;  %v1306_v24 = vpop.f32.mrf.mxu0 }
 0x1af   : > { %v1517_v48 = vadd.f32 %v1516_v16, %v1306_v24 }
 0x1b1   : > { %v3733_v9 = vpop.f32.mrf.mxu3  ;;  %v1574_v53 = vadd.f32 %v3539_v50, %v1517_v48 }
 0x1b3   : > { %v1606_v56 = vmul.f32 0.01, %v1574_v53 }
 0x1b4   : > { %1730 = vmatmul.f32.gmra.mxu2 %v3736_v12  ;;  %1996 = vmatmul.f32.gmra.mxu1 %v3736_v12 }
 0x1b5   : > { %v3807_v60 = vmax.f32 %v1574_v53, %v1606_v56 }
 0x1b6   : > { %1842 = vmatmul.f32.gmra.mxu3 %v3685_v28  ;;  %v1571_v28 = vadd.f32 %v3539_v50, %v1508_v43  ;;  %v1309_v34 = vpop.f32.mrf.mxu0 }
 0x1b7   : > { %v1520_v13 = vadd.f32 %v3725_v5, %v1309_v34 }
 0x1b8   : > { %v1603_v31 = vmul.f32 0.01, %v1571_v28 }
 0x1b9   : > { %v3741_v17 = vpop.f32.mrf.mxu3  ;;  %v3743_v18 = vpop.f32.mrf.mxu1  ;;  %v1575_v20 = vadd.f32 %v3539_v50, %v1520_v13 }
 0x1ba   : > { %v3770_v38 = vmax.f32 %v1571_v28, %v1603_v31 }
 0x1bb   : > { %v1607_v63 = vmul.f32 0.01, %v1575_v20 }
 0x1bc   : > { %1733 = vmatmul.f32.gmra.mxu2 %v3746_v27  ;;  %1999 = vmatmul.f32.gmra.mxu1 %v3746_v27 }
 0x1bd   : > { %v3820_v6 = vmax.f32 %v1575_v20, %v1607_v63 }
 0x1be   : > { %1845 = vmatmul.f32.gmra.mxu3 %v3692_v37  ;;  %v1312_v45 = vpop.f32.mrf.mxu0 }
 0x1bf   : > { %v3751_v49 = vpop.f32.mrf.mxu2  ;;  %v1523_v59 = vadd.f32 %v3733_v9, %v1312_v45 }
 0x1c1   : > { %v3753_v33 = vpop.f32.mrf.mxu3  ;;  %v3755_v25 = vpop.f32.mrf.mxu1  ;;  %v1576_v36 = vadd.f32 %v3539_v50, %v1523_v59 }
 0x1c3   : > { %v1608_v7 = vmul.f32 0.01, %v1576_v36 }
 0x1c4   : > { %1736 = vmatmul.f32.gmra.mxu2 %v3758_v29  ;;  %2002 = vmatmul.f32.gmra.mxu1 %v3758_v29 }
 0x1c5   : > { %v3833_v44 = vmax.f32 %v1576_v36, %v1608_v7 }
 0x1c6   : > { %1848 = vmatmul.f32.gmra.mxu3 %v3699_v41  ;;  %v1315_v55 = vpop.f32.mrf.mxu0 }
 0x1c7   : > { %v3763_v1 = vpop.f32.mrf.mxu2  ;;  %v1526_v30 = vadd.f32 %v3741_v17, %v1315_v55 }
 0x1c9   : > { %v3765_v35 = vpop.f32.mrf.mxu3  ;;  %v3767_v37 = vpop.f32.mrf.mxu1  ;;  %v1577_v14 = vadd.f32 %v3539_v50, %v1526_v30 }
 0x1cb   : > { %v1609_v15 = vmul.f32 0.01, %v1577_v14 }
 0x1cc   : > { %1739 = vmatmul.f32.gmra.mxu2 %v3770_v38  ;;  %2005 = vmatmul.f32.gmra.mxu1 %v3770_v38 }
 0x1ce   : > { %1851 = vmatmul.f32.gmra.mxu3 %v3706_v51  ;;  %v1318_v2 = vpop.f32.mrf.mxu0 }
 0x1cf   : > { %v3775_v61 = vpop.f32.mrf.mxu2  ;;  %v1529_v16 = vadd.f32 %v3753_v33, %v1318_v2 }
 0x1d1   : > { %v3777_v41 = vpop.f32.mrf.mxu3  ;;  %v3779_v11 = vpop.f32.mrf.mxu1  ;;  %v1578_v43 = vadd.f32 %v3539_v50, %v1529_v16 }
 0x1d3   : > { %v1610_v31 = vmul.f32 0.01, %v1578_v43 }
 0x1d4   : > { %1742 = vmatmul.f32.gmra.mxu2 %v3782_v40  ;;  %2008 = vmatmul.f32.gmra.mxu1 %v3782_v40 }
 0x1d5   : > { %v3869_v47 = vmax.f32 %v1578_v43, %v1610_v31 }
 0x1d6   : > { %1854 = vmatmul.f32.gmra.mxu3 %v3714_v57  ;;  %v1321_v8 = vpop.f32.mrf.mxu0 }
 0x1d7   : > { %v3787_v51 = vpop.f32.mrf.mxu2  ;;  %v1532_v32 = vadd.f32 %v3765_v35, %v1321_v8 }
 0x1d9   : > { %v3789_v26 = vpop.f32.mrf.mxu3  ;;  %v3791_v52 = vpop.f32.mrf.mxu1  ;;  %v1579_v42 = vadd.f32 %v3539_v50, %v1532_v32 }
 0x1dc   : > { %1745 = vmatmul.f32.gmra.mxu2 %v3794_v54  ;;  %2011 = vmatmul.f32.gmra.mxu1 %v3794_v54 }
 0x1de   : > { %1857 = vmatmul.f32.gmra.mxu3 %v3720_v0  ;;  %v1324_v24 = vpop.f32.mrf.mxu0 }
 0x1df   : > { %v3800_v46 = vpop.f32.mrf.mxu2  ;;  %v1535_v53 = vadd.f32 %v3777_v41, %v1324_v24 }
 0x1e1   : > { %v3802_v57 = vpop.f32.mrf.mxu3  ;;  %v3804_v58 = vpop.f32.mrf.mxu1  ;;  %v1580_v63 = vadd.f32 %v3539_v50, %v1535_v53 }
 0x1e3   : > { %v1612_v41 = vmul.f32 0.01, %v1580_v63 }
 0x1e4   : > { %1748 = vmatmul.f32.gmra.mxu2 %v3807_v60  ;;  %2014 = vmatmul.f32.gmra.mxu1 %v3807_v60 }
 0x1e5   : > { %v3895_v43 = vmax.f32 %v1580_v63, %v1612_v41 }
 0x1e6   : > { %1860 = vmatmul.f32.gmra.mxu3 %v3728_v4  ;;  %v1327_v35 = vpop.f32.mrf.mxu0 }
 0x1e7   : > { %v3813_v0 = vpop.f32.mrf.mxu2 }
 0x1e9   : > { %v3815_v3 = vpop.f32.mrf.mxu3  ;;  %v3817_v5 = vpop.f32.mrf.mxu1 }
 0x1ec   : > { %1751 = vmatmul.f32.gmra.mxu2 %v3820_v6  ;;  %2017 = vmatmul.f32.gmra.mxu1 %v3820_v6 }
 0x1ee   : > { %1863 = vmatmul.f32.gmra.mxu3 %v3736_v12  ;;  %v3842_v12 = vld [vmem:[%s4302_s11] ss:$0 sm:$0xff]  ;;  %v1330_v7 = vpop.f32.mrf.mxu0 }
 0x1ef   : > { %v3826_v4 = vpop.f32.mrf.mxu2 }
 0x1f1   : > { %v3828_v9 = vpop.f32.mrf.mxu3  ;;  %v3830_v10 = vpop.f32.mrf.mxu1 }
 0x1f4   : > { %1754 = vmatmul.f32.gmra.mxu2 %v3833_v44  ;;  %2020 = vmatmul.f32.gmra.mxu1 %v3833_v44 }
 0x1f6   : > { %1866 = vmatmul.f32.gmra.mxu3 %v3746_v27  ;;  %v3854_v27 = vmax.f32 %v1577_v14, %v1609_v15  ;;  %v1333_v31 = vpop.f32.mrf.mxu0 }
 0x1f7   : > { %v3844_v17 = vpop.f32.mrf.mxu2 }
 0x1f9   : > { %v1819_v19 = vpop.f32.mrf.mxu3  ;;  %v3849_v23 = vpop.f32.mrf.mxu1 }
 0x1fa   : > { %v1820_v33 = vadd.f32 %v3842_v12, %v1819_v19 }
 0x1fc   : > { %v2048_v28 = vmul.f32 0.01, %v1820_v33  ;;  %1757 = vmatmul.f32.gmra.mxu2 %v3854_v27  ;;  %2023 = vmatmul.f32.gmra.mxu1 %v3854_v27 }
 0x1fe   : > { %v2080_v34 = vmax.f32 %v1820_v33, %v2048_v28  ;;  %1869 = vmatmul.f32.gmra.mxu3 %v3758_v29  ;;  %v1611_v29 = vmul.f32 0.01, %v1579_v42 }
 0x1ff   : > { %v3860_v62 = vpop.f32.mrf.mxu2 }
 0x200   : > { %2112 = vst [vmem:[%s3862_s29] sm:$0xff] %v2080_v34  ;;  %v3882_v2 = vmax.f32 %v1579_v42, %v1611_v29 }
 0x201   : > { %v1822_v22 = vpop.f32.mrf.mxu3  ;;  %v3865_v39 = vpop.f32.mrf.mxu1 }
 0x202   : > { %v1823_v45 = vadd.f32 %v3842_v12, %v1822_v22 }
 0x204   : > { %v2049_v48 = vmul.f32 0.01, %v1823_v45  ;;  %1760 = vmatmul.f32.gmra.mxu2 %v3869_v47  ;;  %2026 = vmatmul.f32.gmra.mxu1 %v3869_v47 }
 0x206   : > { %v2081_v55 = vmax.f32 %v1823_v45, %v2049_v48  ;;  %1872 = vmatmul.f32.gmra.mxu3 %v3770_v38  ;;  %v1538_v38 = vadd.f32 %v3789_v26, %v1327_v35 }
 0x207   : > { %v3875_v56 = vpop.f32.mrf.mxu2 }
 0x208   : > { %2113 = vst [vmem:[%s3862_s29 + $0x8] sm:$0xff] %v2081_v55  ;;  %v1581_v16 = vadd.f32 %v3539_v50, %v1538_v38 }
 0x209   : > { %v1825_v13 = vpop.f32.mrf.mxu3  ;;  %v3878_v20 = vpop.f32.mrf.mxu1 }
 0x20a   : > { %v1826_v59 = vadd.f32 %v3842_v12, %v1825_v13  ;;  %v1613_v26 = vmul.f32 0.01, %v1581_v16 }
 0x20c   : > { %v2050_v36 = vmul.f32 0.01, %v1826_v59  ;;  %1763 = vmatmul.f32.gmra.mxu2 %v3882_v2  ;;  %2029 = vmatmul.f32.gmra.mxu1 %v3882_v2  ;;  %v3906_v45 = vmax.f32 %v1581_v16, %v1613_v26 }
 0x20e   : > { %v2082_v30 = vmax.f32 %v1826_v59, %v2050_v36  ;;  %1875 = vmatmul.f32.gmra.mxu3 %v3782_v40  ;;  %v1541_v40 = vadd.f32 %v3802_v57, %v1330_v7  ;;  %v1336_v36 = vpop.f32.mrf.mxu0 }
 0x20f   : > { %v3888_v8 = vpop.f32.mrf.mxu2 }
 0x210   : > { %2114 = vst [vmem:[%s3862_s29 + $0x10] sm:$0xff] %v2082_v30  ;;  %v1582_v22 = vadd.f32 %v3539_v50, %v1541_v40 }
 0x211   : > { %v1828_v14 = vpop.f32.mrf.mxu3  ;;  %v3891_v15 = vpop.f32.mrf.mxu1 }
 0x212   : > { %v1829_v19 = vadd.f32 %v3842_v12, %v1828_v14  ;;  %v1614_v57 = vmul.f32 0.01, %v1582_v22 }
 0x214   : > { %v2051_v24 = vmul.f32 0.01, %v1829_v19  ;;  %1766 = vmatmul.f32.gmra.mxu2 %v3895_v43  ;;  %2032 = vmatmul.f32.gmra.mxu1 %v3895_v43  ;;  %v3917_v59 = vmax.f32 %v1582_v22, %v1614_v57  ;;  %v3944_v57 = vld [vmem:[#allocation7] ss:$0 sm:$0xff] }
 0x216   : > { %v2083_v33 = vmax.f32 %v1829_v19, %v2051_v24  ;;  %1878 = vmatmul.f32.gmra.mxu3 %v3794_v54  ;;  %v1544_v54 = vadd.f32 %v3815_v3, %v1333_v31 }
 0x217   : > { %v3901_v28 = vpop.f32.mrf.mxu2 }
 0x218   : > { %2115 = vst [vmem:[%s3862_s29 + $0x18] sm:$0xff] %v2083_v33  ;;  %v1583_v13 = vadd.f32 %v3539_v50, %v1544_v54  ;;  %v3934_v33 = vld [vmem:[%s4304_s13] ss:$0 sm:$0xff] }
 0x219   : > { %v1831_v32 = vpop.f32.mrf.mxu3  ;;  %v1988_v34 = vpop.f32.mrf.mxu1 }
 0x21a   : > { %v1832_v42 = vadd.f32 %v3842_v12, %v1831_v32  ;;  %v1615_v3 = vmul.f32 0.01, %v1583_v13 }
 0x21c   : > { %v2052_v35 = vmul.f32 0.01, %v1832_v42  ;;  %1769 = vmatmul.f32.gmra.mxu2 %v3906_v45  ;;  %2035 = vmatmul.f32.gmra.mxu1 %v3906_v45  ;;  %v3926_v24 = vmax.f32 %v1583_v13, %v1615_v3 }
 0x21e   : > { %v2084_v48 = vmax.f32 %v1832_v42, %v2052_v35  ;;  %1881 = vmatmul.f32.gmra.mxu3 %v3807_v60  ;;  %v1547_v60 = vadd.f32 %v3828_v9, %v1336_v36 }
 0x21f   : > { %v3912_v29 = vpop.f32.mrf.mxu2 }
 0x220   : > { %2116 = vst [vmem:[%s3862_s29 + $0x20] sm:$0xff] %v2084_v48  ;;  %v1584_v16 = vadd.f32 %v3539_v50, %v1547_v60 }
 0x221   : > { %v1834_v53 = vpop.f32.mrf.mxu3  ;;  %v1991_v55 = vpop.f32.mrf.mxu1 }
 0x222   : > { %v1835_v63 = vadd.f32 %v3842_v12, %v1834_v53  ;;  %v1616_v9 = vmul.f32 0.01, %v1584_v16  ;;  %v1992_v48 = vadd.f32 %v3934_v33, %v1991_v55 }
 0x224   : > { %v2053_v41 = vmul.f32 0.01, %v1835_v63  ;;  %1772 = vmatmul.f32.gmra.mxu2 %v3917_v59  ;;  %2038 = vmatmul.f32.gmra.mxu1 %v3917_v59  ;;  %v3939_v42 = vmax.f32 %v1584_v16, %v1616_v9  ;;  %v1723_v16 = vadd.f32 %v3944_v57, %v3912_v29  ;;  %v1717_v29 = vadd.f32 %v3944_v57, %v3888_v8 }
 0x225   : > { %v1971_v9 = vadd.f32 %v3934_v33, %v3817_v5  ;;  %v1711_v8 = vadd.f32 %v3944_v57, %v3860_v62 }
 0x226   : > { %v2085_v38 = vmax.f32 %v1835_v63, %v2053_v41  ;;  %1884 = vmatmul.f32.gmra.mxu3 %v3820_v6  ;;  %v1989_v63 = vadd.f32 %v3934_v33, %v1988_v34 }
 0x227   : > { %v1725_v7 = vpop.f32.mrf.mxu2 }
 0x228   : > { %2117 = vst [vmem:[%s3862_s29 + $0x28] sm:$0xff] %v2085_v38  ;;  %v1983_v38 = vadd.f32 %v3934_v33, %v3878_v20  ;;  %v1726_v34 = vadd.f32 %v3944_v57, %v1725_v7  ;;  %v1977_v20 = vadd.f32 %v3934_v33, %v3849_v23  ;;  %v1720_v7 = vadd.f32 %v3944_v57, %v3901_v28 }
 0x229   : > { %v1837_v30 = vpop.f32.mrf.mxu3  ;;  %v1994_v14 = vpop.f32.mrf.mxu1  ;;  %v1714_v28 = vadd.f32 %v3944_v57, %v3875_v56  ;;  %v1708_v56 = vadd.f32 %v3944_v57, %v3844_v17 }
 0x22a   : > { %v1838_v19 = vadd.f32 %v3842_v12, %v1837_v30 }
 0x22c   : > { %v2054_v26 = vmul.f32 0.01, %v1838_v19  ;;  %1775 = vmatmul.f32.gmra.mxu2 %v3926_v24  ;;  %2041 = vmatmul.f32.gmra.mxu1 %v3926_v24 }
 0x22e   : > { %v2086_v40 = vmax.f32 %v1838_v19, %v2054_v26  ;;  %1887 = vmatmul.f32.gmra.mxu3 %v3833_v44  ;;  %v1995_v44 = vadd.f32 %v3934_v33, %v1994_v14  ;;  %v1980_v14 = vadd.f32 %v3934_v33, %v3865_v39  ;;  %v1974_v26 = vadd.f32 %v3934_v33, %v3830_v10 }
 0x22f   : > { %v1728_v6 = vpop.f32.mrf.mxu2  ;;  %v1968_v10 = vadd.f32 %v3934_v33, %v3804_v58  ;;  %v1962_v58 = vadd.f32 %v3934_v33, %v3779_v11  ;;  %v1956_v11 = vadd.f32 %v3934_v33, %v3755_v25 }
 0x230   : > { %2118 = vst [vmem:[%s3862_s29 + $0x30] sm:$0xff] %v2086_v40  ;;  %v1729_v3 = vadd.f32 %v3944_v57, %v1728_v6 }
 0x231   : > { %v1840_v50 = vpop.f32.mrf.mxu3  ;;  %v1997_v31 = vpop.f32.mrf.mxu1 }
 0x232   : > { %v1841_v32 = vadd.f32 %v3842_v12, %v1840_v50  ;;  %v1998_v22 = vadd.f32 %v3934_v33, %v1997_v31  ;;  %v1705_v31 = vadd.f32 %v3944_v57, %v3826_v4  ;;  %v1699_v4 = vadd.f32 %v3944_v57, %v3800_v46 }
 0x233   : > { %v1953_v46 = vadd.f32 %v3934_v33, %v3743_v18 }
 0x234   : > { %v2055_v35 = vmul.f32 0.01, %v1841_v32  ;;  %1778 = vmatmul.f32.gmra.mxu2 %v3939_v42  ;;  %2044 = vmatmul.f32.gmra.mxu1 %v3939_v42 }
 0x235   : > { %2148 = vmatpush.msrb.mxu0 %v1998_v22 }
 0x236   : > { %v2087_v54 = vmax.f32 %v1841_v32, %v2055_v35  ;;  %1890 = vmatmul.f32.gmra.mxu3 %v3854_v27  ;;  %v1986_v27 = vadd.f32 %v3934_v33, %v3891_v15  ;;  %v1702_v32 = vadd.f32 %v3944_v57, %v3813_v0  ;;  %v1696_v0 = vadd.f32 %v3944_v57, %v3787_v51 }
 0x237   : > { %2149 = vmatpush.msrb.mxu0 %v1995_v44  ;;  %v1731_v53 = vpop.f32.mrf.mxu2  ;;  %v1690_v51 = vadd.f32 %v3944_v57, %v3763_v1 }
 0x238   : > { %2119 = vst [vmem:[%s3862_s29 + $0x38] sm:$0xff] %v2087_v54  ;;  %v1732_v13 = vadd.f32 %v3944_v57, %v1731_v53  ;;  %v1693_v54 = vadd.f32 %v3944_v57, %v3775_v61  ;;  %v1687_v53 = vadd.f32 %v3944_v57, %v3751_v49 }
 0x239   : > { %2150 = vmatpush.msrb.mxu0 %v1992_v48  ;;  %v1843_v36 = vpop.f32.mrf.mxu3  ;;  %v3951_v41 = vpop.f32.mrf.mxu1 }
 0x23a   : > { %v1844_v60 = vadd.f32 %v3842_v12, %v1843_v36  ;;  %2206 = vmatpush.msra.mxu3 %v1732_v13 }
 0x23b   : > { %2151 = vmatpush.msrb.mxu0 %v1989_v63 }
 0x23c   : > { %v2056_v55 = vmul.f32 0.01, %v1844_v60  ;;  %2207 = vmatpush.msra.mxu3 %v1729_v3 }
 0x23d   : > { %2152 = vmatpush.msrb.mxu0 %v1986_v27 }
 0x23e   : > { %v2088_v30 = vmax.f32 %v1844_v60, %v2056_v55  ;;  %1893 = vmatmul.f32.gmra.mxu3 %v3869_v47 }
 0x23f   : > { %2153 = vmatpush.msrb.mxu0 %v1983_v38  ;;  %2208 = vmatpush.msra.mxu3 %v1726_v34  ;;  %v3965_v15 = vpop.f32.mrf.mxu2 }
 0x240   : > { %2120 = vst [vmem:[%s3862_s29 + $0x40] sm:$0xff] %v2088_v30 }
 0x241   : > { %2154 = vmatpush.msrb.mxu0 %v1980_v14  ;;  %2209 = vmatpush.msra.mxu3 %v1723_v16  ;;  %v1846_v47 = vpop.f32.mrf.mxu3  ;;  %v3972_v19 = vpop.f32.mrf.mxu1 }
 0x242   : > { %v1847_v39 = vadd.f32 %v3842_v12, %v1846_v47 }
 0x243   : > { %2155 = vmatpush.msrb.mxu0 %v1977_v20  ;;  %2210 = vmatpush.msra.mxu3 %v1720_v7 }
 0x244   : > { %v2057_v23 = vmul.f32 0.01, %v1847_v39 }
 0x245   : > { %2156 = vmatpush.msrb.mxu0 %v1974_v26  ;;  %2211 = vmatpush.msra.mxu3 %v1717_v29 }
 0x246   : > { %v2089_v40 = vmax.f32 %v1847_v39, %v2057_v23  ;;  %1896 = vmatmul.f32.gmra.mxu3 %v3882_v2  ;;  %v1965_v2 = vadd.f32 %v3934_v33, %v3791_v52  ;;  %v1959_v52 = vadd.f32 %v3934_v33, %v3767_v37 }
 0x247   : > { %2157 = vmatpush.msrb.mxu0 %v1971_v9  ;;  %2212 = vmatpush.msra.mxu3 %v1714_v28  ;;  %v3986_v6 = vpop.f32.mrf.mxu2 }
 0x248   : > { %2121 = vst [vmem:[%s3862_s29 + $0x48] sm:$0xff] %v2089_v40 }
 0x249   : > { %2158 = vmatpush.msrb.mxu0 %v1968_v10  ;;  %2213 = vmatpush.msra.mxu3 %v1711_v8  ;;  %v1849_v5 = vpop.f32.mrf.mxu3  ;;  %v3993_v50 = vpop.f32.mrf.mxu1 }
 0x24a   : > { %v1850_v62 = vadd.f32 %v3842_v12, %v1849_v5 }
 0x24b   : > { %2159 = vmatpush.msrb.mxu0 %v1965_v2  ;;  %2214 = vmatpush.msra.mxu3 %v1708_v56 }
 0x24c   : > { %v2058_v17 = vmul.f32 0.01, %v1850_v62 }
 0x24d   : > { %2160 = vmatpush.msrb.mxu0 %v1962_v58  ;;  %2215 = vmatpush.msra.mxu3 %v1705_v31 }
 0x24e   : > { %v2090_v22 = vmax.f32 %v1850_v62, %v2058_v17  ;;  %1899 = vmatmul.f32.gmra.mxu3 %v3895_v43 }
 0x24f   : > { %2161 = vmatpush.msrb.mxu0 %v1959_v52  ;;  %2216 = vmatpush.msra.mxu3 %v1702_v32  ;;  %v4009_v35 = vpop.f32.mrf.mxu2 }
 0x250   : > { %2122 = vst [vmem:[%s3862_s29 + $0x50] sm:$0xff] %v2090_v22 }
 0x251   : > { %2162 = vmatpush.msrb.mxu0 %v1956_v11  ;;  %2217 = vmatpush.msra.mxu3 %v1699_v4  ;;  %v1852_v37 = vpop.f32.mrf.mxu3  ;;  %v4016_v44 = vpop.f32.mrf.mxu1 }
 0x252   : > { %v1853_v43 = vadd.f32 %v3842_v12, %v1852_v37 }
 0x253   : > { %2163 = vmatpush.msrb.mxu0 %v1953_v46  ;;  %2218 = vmatpush.msra.mxu3 %v1696_v0 }
 0x254   : > { %v2059_v25 = vmul.f32 0.01, %v1853_v43 }
 0x255   : > { %2219 = vmatpush.msra.mxu3 %v1693_v54 }
 0x256   : > { %v2091_v48 = vmax.f32 %v1853_v43, %v2059_v25  ;;  %1902 = vmatmul.f32.gmra.mxu3 %v3906_v45 }
 0x257   : > { %2220 = vmatpush.msra.mxu3 %v1690_v51  ;;  %v4028_v18 = vpop.f32.mrf.mxu2 }
 0x258   : > { %2123 = vst [vmem:[%s3862_s29 + $0x58] sm:$0xff] %v2091_v48 }
 0x259   : > { %2221 = vmatpush.msra.mxu3 %v1687_v53  ;;  %v1855_v61 = vpop.f32.mrf.mxu3  ;;  %v4031_v13 = vpop.f32.mrf.mxu1  ;;  %v4090_v53 = vld [vmem:[%s672_s14] sm:$0x3]  ;;  %s2840_s14 = sshra.s32 %s2311_s22, 4  ;;  %s2841_s14 = int_to_ptr.hbm [resolvable:$true] %s2840_s14 }
 0x25a   : > { %v1856_v63 = vadd.f32 %v3842_v12, %v1855_v61  ;;  %v4093_v61 = vshrl.u32 %v759_v21, 7  ;;  %s2842_s18 = scalar_lea.hbm %s2841_s14, 256  ;;  %p2847_p6 = scmp.lt.s32.totalorder %s2841_s14, %s4340_s27 }
 0x25b   : > { %p2843_p2 = scmp.ne.s32.totalorder %s2841_s14, %s2842_s18  ;;  %p2848_p7 = scmp.lt.s32.totalorder %s2846_s15, %s2842_s18 }
 0x25c   : > { %v2060_v1 = vmul.f32 0.01, %v1856_v63 }
 0x25d   : > { %p2844_p3 = pnand %p2843_p2, %p3076_p4  ;;  %p2849_p9 = por %p2848_p7, %p2847_p6 }
 0x25e   : > { %v2092_v36 = vmax.f32 %v1856_v63, %v2060_v1  ;;  %1905 = vmatmul.f32.gmra.mxu3 %v3917_v59  ;;  %v1144_v63 = vperm.slane %v4090_v53, 0 }
 0x25f   : > { %v4035_v3 = vpop.f32.mrf.mxu2  ;;  %p2845_p5 = pneg %p2844_p3 }
 0x260   : > { %2124 = vst [vmem:[%s3862_s29 + $0x60] sm:$0xff] %v2092_v36  ;;  %vm1146_vm2 = vcmp.eq.s32.totalorder %v4093_v61, %v1144_v63 }
 0x261   : > { %v1858_v49 = vpop.f32.mrf.mxu3  ;;  %v4038_v45 = vpop.f32.mrf.mxu1  ;;  %p2850_p10 = pnand %p2849_p9, %p2845_p5 }
 0x262   : > { %v1859_v60 = vadd.f32 %v3842_v12, %v1858_v49  ;;  %v2953_v49 = vmov 1.0  }
 0x263   : > { %2589 = vmatmul.msk.f32.vlgmr.msrb.gmra.mxu0 %vm1146_vm2, %v2953_v49 }
 0x264   : > { %v2061_v27 = vmul.f32 0.01, %v1859_v60 }
 0x266   : > { %v2093_v55 = vmax.f32 %v1859_v60, %v2061_v27  ;;  %1908 = vmatmul.f32.gmra.mxu3 %v3926_v24 }
 0x267   : > { %v4042_v38 = vpop.f32.mrf.mxu2 }
 0x268   : > { %2125 = vst [vmem:[%s3862_s29 + $0x68] sm:$0xff] %v2093_v55 }
 0x269   : > { %v1861_v34 = vpop.f32.mrf.mxu3  ;;  %v4045_v30 = vpop.f32.mrf.mxu1 }
 0x26a   : > { %v1862_v59 = vadd.f32 %v3842_v12, %v1861_v34 }
 0x26c   : > { %v2062_v14 = vmul.f32 0.01, %v1862_v59 }
 0x26e   : > { %v2094_v16 = vmax.f32 %v1862_v59, %v2062_v14  ;;  %1911 = vmatmul.f32.gmra.mxu3 %v3939_v42  ;;  %v4101_v59 = vadd.s32 8, %v4093_v61 }
 0x26f   : > { %v4049_v20 = vpop.f32.mrf.mxu2 }
 0x270   : > { %2126 = vst [vmem:[%s3862_s29 + $0x70] sm:$0xff] %v2094_v16  ;;  %vm1148_vm7 = vcmp.eq.s32.totalorder %v4101_v59, %v1144_v63 }
 0x271   : > { %v1864_v7 = vpop.f32.mrf.mxu3  ;;  %v4052_v47 = vpop.f32.mrf.mxu1  ;;  %2590 = vmatmul.msk.f32.gmra.mxu0 %vm1148_vm7, %v2953_v49 }
 0x272   : > { %v1865_v24 = vadd.f32 %v3842_v12, %v1864_v7 }
 0x274   : > { %v2063_v39 = vmul.f32 0.01, %v1865_v24 }
 0x276   : > { %v2095_v29 = vmax.f32 %v1865_v24, %v2063_v39 }
 0x277   : > { %v4055_v26 = vpop.f32.mrf.mxu2 }
 0x278   : > { %2127 = vst [vmem:[%s3862_s29 + $0x78] sm:$0xff] %v2095_v29  ;;  %v4108_v29 = vadd.s32 16, %v4093_v61 }
 0x279   : > { %v1867_v23 = vpop.f32.mrf.mxu3  ;;  %v4058_v28 = vpop.f32.mrf.mxu1 }
 0x27a   : > { %v1868_v42 = vadd.f32 %v3842_v12, %v1867_v23  ;;  %vm1150_vm8 = vcmp.eq.s32.totalorder %v4108_v29, %v1144_v63 }
 0x27b   : > { %2591 = vmatmul.msk.f32.gmra.mxu0 %vm1150_vm8, %v2953_v49 }
 0x27c   : > { %v2064_v9 = vmul.f32 0.01, %v1868_v42 }
 0x27e   : > { %v2096_v40 = vmax.f32 %v1868_v42, %v2064_v9 }
 0x27f   : > { %v4061_v8 = vpop.f32.mrf.mxu2 }
 0x280   : > { %2128 = vst [vmem:[%s3862_s29 + $0x80] sm:$0xff] %v2096_v40 }
 0x281   : > { %v1870_v10 = vpop.f32.mrf.mxu3  ;;  %v4064_v56 = vpop.f32.mrf.mxu1 }
 0x282   : > { %v1871_v5 = vadd.f32 %v3842_v12, %v1870_v10 }
 0x284   : > { %v2065_v2 = vmul.f32 0.01, %v1871_v5 }
 0x286   : > { %v2097_v62 = vmax.f32 %v1871_v5, %v2065_v2 }
 0x287   : > { %v4067_v31 = vpop.f32.mrf.mxu2 }
 0x288   : > { %2129 = vst [vmem:[%s3862_s29 + $0x88] sm:$0xff] %v2097_v62  ;;  %v4119_v62 = vld [vmem:[%s665_s20] sm:$0x3] }
 0x289   : > { %v1873_v58 = vpop.f32.mrf.mxu3  ;;  %v4070_v17 = vpop.f32.mrf.mxu1 }
 0x28a   : > { %v1874_v32 = vadd.f32 %v3842_v12, %v1873_v58  ;;  %v4122_v58 = vadd.s32 24, %v4093_v61 }
 0x28c   : > { %v2066_v52 = vmul.f32 0.01, %v1874_v32  ;;  %vm1152_vm9 = vcmp.eq.s32.totalorder %v4122_v58, %v1144_v63 }
 0x28d   : > { %2592 = vmatmul.msk.f32.gmra.mxu0 %vm1152_vm9, %v2953_v49 }
 0x28e   : > { %v2098_v22 = vmax.f32 %v1874_v32, %v2066_v52  ;;  %v4125_v32 = vperm.slane %v4119_v62, 0 }
 0x28f   : > { %v4074_v4 = vpop.f32.mrf.mxu2 }
 0x290   : > { %2130 = vst [vmem:[%s3862_s29 + $0x90] sm:$0xff] %v2098_v22  ;;  %vm1120_vm10 = vcmp.eq.s32.totalorder %v4093_v61, %v4125_v32  ;;  %vm1122_vm11 = vcmp.eq.s32.totalorder %v4101_v59, %v4125_v32  ;;  %vm1124_vm12 = vcmp.eq.s32.totalorder %v4108_v29, %v4125_v32  ;;  %vm1126_vm13 = vcmp.eq.s32.totalorder %v4122_v58, %v4125_v32 }
 0x291   : > { %v1876_v11 = vpop.f32.mrf.mxu3  ;;  %v4077_v0 = vpop.f32.mrf.mxu1  ;;  %2597 = vmatmul.msk.f32.vlgmr.msra.gmra.mxu3 %vm1120_vm10, %v2953_v49 }
 0x292   : > { %v1877_v37 = vadd.f32 %v3842_v12, %v1876_v11  ;;  %v2034_v63 = vadd.f32 %v3934_v33, %v4077_v0  ;;  %v2028_v0 = vadd.f32 %v3934_v33, %v4064_v56  ;;  %v2022_v56 = vadd.f32 %v3934_v33, %v4052_v47 }
 0x293   : > { %v2016_v47 = vadd.f32 %v3934_v33, %v4038_v45  ;;  %v2010_v45 = vadd.f32 %v3934_v33, %v4016_v44  ;;  %v2004_v44 = vadd.f32 %v3934_v33, %v3972_v19 }
 0x294   : > { %v2067_v46 = vmul.f32 0.01, %v1877_v37 }
 0x296   : > { %v2099_v43 = vmax.f32 %v1877_v37, %v2067_v46 }
 0x297   : > { %v4082_v54 = vpop.f32.mrf.mxu2 }
 0x298   : > { %2131 = vst [vmem:[%s3862_s29 + $0x98] sm:$0xff] %v2099_v43 }
 0x299   : > { %v1879_v25 = vpop.f32.mrf.mxu3  ;;  %v2036_v51 = vpop.f32.mrf.mxu1  ;;  %2598 = vmatmul.msk.f32.gmra.mxu3 %vm1122_vm11, %v2953_v49 }
 0x29a   : > { %v1880_v48 = vadd.f32 %v3842_v12, %v1879_v25  ;;  %v2037_v43 = vadd.f32 %v3934_v33, %v2036_v51 }
 0x29c   : > { %v2068_v1 = vmul.f32 0.01, %v1880_v48 }
 0x29e   : > { %v2100_v36 = vmax.f32 %v1880_v48, %v2068_v1 }
 0x29f   : > { %v1770_v60 = vpop.f32.mrf.mxu2 }
 0x2a0   : > { %2132 = vst [vmem:[%s3862_s29 + $0xa0] sm:$0xff] %v2100_v36 }
 0x2a1   : > { %v1882_v27 = vpop.f32.mrf.mxu3  ;;  %v2039_v55 = vpop.f32.mrf.mxu1  ;;  %2599 = vmatmul.msk.f32.gmra.mxu3 %vm1124_vm12, %v2953_v49 }
 0x2a2   : > { %v1883_v34 = vadd.f32 %v3842_v12, %v1882_v27  ;;  %v2040_v11 = vadd.f32 %v3934_v33, %v2039_v55  ;;  %v2031_v27 = vadd.f32 %v3934_v33, %v4070_v17  ;;  %v2025_v17 = vadd.f32 %v3934_v33, %v4058_v28 }
 0x2a3   : > { %v2019_v28 = vadd.f32 %v3934_v33, %v4045_v30  ;;  %v2013_v30 = vadd.f32 %v3934_v33, %v4031_v13  ;;  %v2007_v13 = vadd.f32 %v3934_v33, %v3993_v50  ;;  %v2001_v50 = vadd.f32 %v3934_v33, %v3951_v41 }
 0x2a4   : > { %v2069_v21 = vmul.f32 0.01, %v1883_v34 }
 0x2a6   : > { %v2101_v14 = vmax.f32 %v1883_v34, %v2069_v21  ;;  %v1771_v34 = vadd.f32 %v3944_v57, %v1770_v60  ;;  %v1765_v60 = vadd.f32 %v3944_v57, %v4074_v4  ;;  %v1759_v4 = vadd.f32 %v3944_v57, %v4061_v8 }
 0x2a7   : > { %v1773_v16 = vpop.f32.mrf.mxu2  ;;  %v1753_v8 = vadd.f32 %v3944_v57, %v4049_v20  ;;  %v1747_v20 = vadd.f32 %v3944_v57, %v4035_v3  ;;  %v1741_v3 = vadd.f32 %v3944_v57, %v4009_v35 }
 0x2a8   : > { %2133 = vst [vmem:[%s3862_s29 + $0xa8] sm:$0xff] %v2101_v14  ;;  %v1774_v51 = vadd.f32 %v3944_v57, %v1773_v16  ;;  %v1768_v14 = vadd.f32 %v3944_v57, %v4082_v54  ;;  %v1762_v54 = vadd.f32 %v3944_v57, %v4067_v31  ;;  %v1756_v31 = vadd.f32 %v3944_v57, %v4055_v26 }
 0x2a9   : > { %v1885_v7 = vpop.f32.mrf.mxu3  ;;  %v2042_v24 = vpop.f32.mrf.mxu1  ;;  %v1750_v26 = vadd.f32 %v3944_v57, %v4042_v38  ;;  %2600 = vmatmul.msk.f32.gmra.mxu3 %vm1126_vm13, %v2953_v49  ;;  %v1744_v38 = vadd.f32 %v3944_v57, %v4028_v18  ;;  %v1735_v18 = vadd.f32 %v3944_v57, %v3965_v15 }
 0x2aa   : > { %v1886_v39 = vadd.f32 %v3842_v12, %v1885_v7  ;;  %v2043_v52 = vadd.f32 %v3934_v33, %v2042_v24 }
 0x2ac   : > { %v2070_v23 = vmul.f32 0.01, %v1886_v39 }
 0x2ae   : > { %v2102_v42 = vmax.f32 %v1886_v39, %v2070_v23 }
 0x2af   : > { %v1776_v9 = vpop.f32.mrf.mxu2 }
 0x2b0   : > { %2134 = vst [vmem:[%s3862_s29 + $0xb0] sm:$0xff] %v2102_v42  ;;  %v1777_v1 = vadd.f32 %v3944_v57, %v1776_v9 }
 0x2b1   : > { %v1888_v40 = vpop.f32.mrf.mxu3  ;;  %v2045_v10 = vpop.f32.mrf.mxu1 }
 0x2b2   : > { %v1889_v5 = vadd.f32 %v3842_v12, %v1888_v40  ;;  %v2046_v2 = vadd.f32 %v3934_v33, %v2045_v10  ;;  %v1145_v40 = vperm.slane %v4090_v53, 1  ;;  %v1738_v33 = vadd.f32 %v3944_v57, %v3986_v6 }
 0x2b4   : > { %v2071_v22 = vmul.f32 0.01, %v1889_v5  ;;  %2177 = vmatpush.msra.mxu2 %v2046_v2  ;;  %vm1147_vm14 = vcmp.eq.s32.totalorder %v4093_v61, %v1145_v40  ;;  %vm1149_vm0 = vcmp.eq.s32.totalorder %v4101_v59, %v1145_v40  ;;  %vm1151_vm3 = vcmp.eq.s32.totalorder %v4108_v29, %v1145_v40 }
 0x2b5   : > { %vm1153_vm5 = vcmp.eq.s32.totalorder %v4122_v58, %v1145_v40 }
 0x2b6   : > { %v2103_v37 = vmax.f32 %v1889_v5, %v2071_v22  ;;  %2178 = vmatpush.msra.mxu2 %v2043_v52  ;;  %v1119_v5 = vperm.slane %v4119_v62, 1 }
 0x2b7   : > { %v1779_v46 = vpop.f32.mrf.mxu2 }
 0x2b8   : > { %2135 = vst [vmem:[%s3862_s29 + $0xb8] sm:$0xff] %v2103_v37  ;;  %v1780_v25 = vadd.f32 %v3944_v57, %v1779_v46  ;;  %2179 = vmatpush.msra.mxu2 %v2040_v11  ;;  %vm1121_vm15 = vcmp.eq.s32.totalorder %v4093_v61, %v1119_v5  ;;  %vm1123_vm1 = vcmp.eq.s32.totalorder %v4101_v59, %v1119_v5 }
 0x2b9   : > { %v1891_v48 = vpop.f32.mrf.mxu3  ;;  %vm1125_vm4 = vcmp.eq.s32.totalorder %v4108_v29, %v1119_v5  ;;  %vm1127_vm6 = vcmp.eq.s32.totalorder %v4122_v58, %v1119_v5 }
 0x2ba   : > { %v1892_v36 = vadd.f32 %v3842_v12, %v1891_v48  ;;  %2180 = vmatpush.msra.mxu2 %v2037_v43  ;;  %2235 = vmatpush.msra.mxu0 %v1780_v25 }
 0x2bc   : > { %v2072_v55 = vmul.f32 0.01, %v1892_v36  ;;  %2181 = vmatpush.msra.mxu2 %v2034_v63  ;;  %2236 = vmatpush.msra.mxu0 %v1777_v1 }
 0x2be   : > { %v2104_v21 = vmax.f32 %v1892_v36, %v2072_v55  ;;  %2182 = vmatpush.msra.mxu2 %v2031_v27  ;;  %2237 = vmatpush.msra.mxu0 %v1774_v51 }
 0x2c0   : > { %2136 = vst [vmem:[%s3862_s29 + $0xc0] sm:$0xff] %v2104_v21  ;;  %2183 = vmatpush.msra.mxu2 %v2028_v0  ;;  %2238 = vmatpush.msra.mxu0 %v1771_v34 }
 0x2c1   : > { %v1894_v16 = vpop.f32.mrf.mxu3 }
 0x2c2   : > { %v1895_v7 = vadd.f32 %v3842_v12, %v1894_v16  ;;  %2184 = vmatpush.msra.mxu2 %v2025_v17  ;;  %2239 = vmatpush.msra.mxu0 %v1768_v14 }
 0x2c4   : > { %v2073_v24 = vmul.f32 0.01, %v1895_v7  ;;  %2185 = vmatpush.msra.mxu2 %v2022_v56  ;;  %2240 = vmatpush.msra.mxu0 %v1765_v60 }
 0x2c6   : > { %v2105_v39 = vmax.f32 %v1895_v7, %v2073_v24  ;;  %2186 = vmatpush.msra.mxu2 %v2019_v28  ;;  %2241 = vmatpush.msra.mxu0 %v1762_v54 }
 0x2c8   : > { %2137 = vst [vmem:[%s3862_s29 + $0xc8] sm:$0xff] %v2105_v39  ;;  %2187 = vmatpush.msra.mxu2 %v2016_v47  ;;  %2242 = vmatpush.msra.mxu0 %v1759_v4 }
 0x2c9   : > { %v1897_v23 = vpop.f32.mrf.mxu3 }
 0x2ca   : > { %v1898_v42 = vadd.f32 %v3842_v12, %v1897_v23  ;;  %2188 = vmatpush.msra.mxu2 %v2013_v30  ;;  %2243 = vmatpush.msra.mxu0 %v1756_v31 }
 0x2cc   : > { %v2074_v9 = vmul.f32 0.01, %v1898_v42  ;;  %2189 = vmatpush.msra.mxu2 %v2010_v45  ;;  %2244 = vmatpush.msra.mxu0 %v1753_v8 }
 0x2ce   : > { %v2106_v10 = vmax.f32 %v1898_v42, %v2074_v9  ;;  %2190 = vmatpush.msra.mxu2 %v2007_v13  ;;  %2245 = vmatpush.msra.mxu0 %v1750_v26 }
 0x2d0   : > { %2138 = vst [vmem:[%s3862_s29 + $0xd0] sm:$0xff] %v2106_v10  ;;  %2191 = vmatpush.msra.mxu2 %v2004_v44  ;;  %2246 = vmatpush.msra.mxu0 %v1747_v20 }
 0x2d1   : > { %v1900_v19 = vpop.f32.mrf.mxu3 }
 0x2d2   : > { %v1901_v53 = vadd.f32 %v3842_v12, %v1900_v19  ;;  %2192 = vmatpush.msra.mxu2 %v2001_v50  ;;  %2247 = vmatpush.msra.mxu0 %v1744_v38 }
 0x2d3   : > { %2593 = vmatmul.msk.f32.vlgmr.msra.gmra.mxu2 %vm1147_vm14, %v2953_v49 }
 0x2d4   : > { %v2075_v41 = vmul.f32 0.01, %v1901_v53  ;;  %2248 = vmatpush.msra.mxu0 %v1741_v3 }
 0x2d6   : > { %v2107_v2 = vmax.f32 %v1901_v53, %v2075_v41  ;;  %2249 = vmatpush.msra.mxu0 %v1738_v33 }
 0x2d8   : > { %2139 = vst [vmem:[%s3862_s29 + $0xd8] sm:$0xff] %v2107_v2  ;;  %2250 = vmatpush.msra.mxu0 %v1735_v18 }
 0x2d9   : > { %v1903_v35 = vpop.f32.mrf.mxu3  ;;  %2601 = vmatmul.msk.f32.vlgmr.msra.gmra.mxu0 %vm1121_vm15, %v2953_v49 }
 0x2da   : > { %v1904_v6 = vadd.f32 %v3842_v12, %v1903_v35 }
 0x2db   : > { %2594 = vmatmul.msk.f32.gmra.mxu2 %vm1149_vm0, %v2953_v49 }
 0x2dc   : > { %v2076_v62 = vmul.f32 0.01, %v1904_v6 }
 0x2de   : > { %v2108_v32 = vmax.f32 %v1904_v6, %v2076_v62 }
 0x2e0   : > { %2140 = vst [vmem:[%s3862_s29 + $0xe0] sm:$0xff] %v2108_v32 }
 0x2e1   : > { %v1906_v57 = vpop.f32.mrf.mxu3  ;;  %2602 = vmatmul.msk.f32.gmra.mxu0 %vm1123_vm1, %v2953_v49 }
 0x2e2   : > { %v1907_v15 = vadd.f32 %v3842_v12, %v1906_v57 }
 0x2e3   : > { %2595 = vmatmul.msk.f32.gmra.mxu2 %vm1151_vm3, %v2953_v49 }
 0x2e4   : > { %v2077_v61 = vmul.f32 0.01, %v1907_v15 }
 0x2e6   : > { %v2109_v52 = vmax.f32 %v1907_v15, %v2077_v61 }
 0x2e8   : > { %2141 = vst [vmem:[%s3862_s29 + $0xe8] sm:$0xff] %v2109_v52 }
 0x2e9   : > { %v1909_v59 = vpop.f32.mrf.mxu3  ;;  %2603 = vmatmul.msk.f32.gmra.mxu0 %vm1125_vm4, %v2953_v49 }
 0x2ea   : > { %v1910_v22 = vadd.f32 %v3842_v12, %v1909_v59 }
 0x2eb   : > { %2596 = vmatmul.msk.f32.gmra.mxu2 %vm1153_vm5, %v2953_v49 }
 0x2ec   : > { %v2078_v11 = vmul.f32 0.01, %v1910_v22 }
 0x2ee   : > { %v2110_v37 = vmax.f32 %v1910_v22, %v2078_v11 }
 0x2f0   : > { %2142 = vst [vmem:[%s3862_s29 + $0xf0] sm:$0xff] %v2110_v37 }
 0x2f1   : > { %v1912_v46 = vpop.f32.mrf.mxu3  ;;  %2604 = vmatmul.msk.f32.gmra.mxu0 %vm1127_vm6, %v2953_v49 }
 0x2f2   : > { %v1913_v29 = vadd.f32 %v3842_v12, %v1912_v46 }
 0x2f4   : > { %v2079_v43 = vmul.f32 0.01, %v1913_v29 }
 0x2f6   : > { %v2111_v25 = vmax.f32 %v1913_v29, %v2079_v43 }
 0x2f8   : > { %2143 = vst [vmem:[%s3862_s29 + $0xf8] sm:$0xff] %v2111_v25 }
 0x2f9   : > { %2853 = shalt.err (!%p2850_p10)
}
 0x2fa   : > { %s2954_s29 = smov 128   ;;  %s2955_s24 = smov 8   ;;  %v2165_v12 = vpop.f32.mrf.mxu0 }
 0x2fb   : > { %2644 = dma.vmem_to_hbm [thread:$0]  (%p3076_p4), %s2309_s25, 4096, %s2311_s22, %s2278_s2, %s2954_s29, %s2954_s29, %s2955_s24  }
 0x2fc   : > { %s2499_s0 = sshll.u32 %s3847_s16, 5  ;;  %s4341_s25 = sld [smem:[#allocation26_spill]] }
 0x2fd   : > { %s637_s28 = scalar_lea.vmem [#allocation8], %s2499_s0  ;;  %s2273_s18 = scalar_lea.sflag [#allocation4], %s3847_s16 }
 0x2fe   : > { %s2290_s2 = sshll.u32 %s637_s28, 4  ;;  %s2291_s2 = int_to_ptr.vmem [resolvable:$true] %s2290_s2 }
 0x302   : > { %v2168_v49 = vpop.f32.mrf.mxu0  ;;  %s2289_s22 = scalar_lea.hbm %s4341_s25, %s3133_s7  ;;  %s2874_s7 = scalar_lea.hbm %s4341_s25, 64 }
 0x303   : > { %s2292_s14 = sshll.u32 %s2289_s22, 4  ;;  %s2293_s14 = int_to_ptr.hbm [resolvable:$true] %s2292_s14 }
 0x304   : > { %s2868_s30 = sshra.s32 %s2293_s14, 4  ;;  %s2869_s30 = int_to_ptr.hbm [resolvable:$true] %s2868_s30 }
 0x305   : > { %s2870_s21 = scalar_lea.hbm %s2869_s30, 32  ;;  %p2875_p0 = scmp.lt.s32.totalorder %s2869_s30, %s4341_s25 }
 0x306   : > { %p2871_p11 = scmp.ne.s32.totalorder %s2869_s30, %s2870_s21  ;;  %p2876_p1 = scmp.lt.s32.totalorder %s2874_s7, %s2870_s21 }
 0x308   : > { %p2872_p12 = pnand %p2871_p11, %p3076_p4  ;;  %p2877_p2 = por %p2876_p1, %p2875_p0 }
 0x30a   : > { %v2171_v58 = vpop.f32.mrf.mxu0  ;;  %p2873_p13 = pneg %p2872_p12 }
 0x30c   : > { %p2878_p3 = pnand %p2877_p2, %p2873_p13 }
 0x312   : > { %v2174_v48 = vpop.f32.mrf.mxu0 }
 0x314   : > { %v2223_v63 = vpop.f32.mrf.mxu3 }
 0x31c   : > { %v2226_v55 = vpop.f32.mrf.mxu3 }
 0x324   : > { %v2229_v56 = vpop.f32.mrf.mxu3 }
 0x32c   : > { %v2232_v4 = vpop.f32.mrf.mxu3 }
 0x356   : > { %v2194_v1 = vpop.f32.mrf.mxu2  ;;  %v2252_v36 = vpop.f32.mrf.mxu0 }
 0x357   : > { %v2195_v27 = vadd.f32 %v2194_v1, %v2165_v12 }
 0x359   : > { %v2224_v51 = vadd.f32 %v2223_v63, %v2195_v27 }
 0x35b   : > { %v2253_v0 = vadd.f32 %v2252_v36, %v2224_v51 }
 0x35d   : > { %2268 = vst [vmem:[%s637_s28] sm:$0xff] %v2253_v0 }
 0x35e   : > { %v2197_v34 = vpop.f32.mrf.mxu2  ;;  %v2255_v21 = vpop.f32.mrf.mxu0 }
 0x35f   : > { %v2198_v17 = vadd.f32 %v2197_v34, %v2168_v49 }
 0x361   : > { %v2227_v14 = vadd.f32 %v2226_v55, %v2198_v17 }
 0x363   : > { %v2256_v16 = vadd.f32 %v2255_v21, %v2227_v14 }
 0x365   : > { %2269 = vst [vmem:[%s637_s28 + $0x8] sm:$0xff] %v2256_v16 }
 0x366   : > { %v2200_v60 = vpop.f32.mrf.mxu2  ;;  %v2258_v7 = vpop.f32.mrf.mxu0 }
 0x367   : > { %v2201_v28 = vadd.f32 %v2200_v60, %v2171_v58 }
 0x369   : > { %v2230_v54 = vadd.f32 %v2229_v56, %v2201_v28 }
 0x36b   : > { %v2259_v24 = vadd.f32 %v2258_v7, %v2230_v54 }
 0x36d   : > { %2270 = vst [vmem:[%s637_s28 + $0x10] sm:$0xff] %v2259_v24 }
 0x36e   : > { %v2203_v47 = vpop.f32.mrf.mxu2  ;;  %v2261_v30 = vpop.f32.mrf.mxu0 }
 0x36f   : > { %v2204_v39 = vadd.f32 %v2203_v47, %v2174_v48 }
 0x371   : > { %v2233_v31 = vadd.f32 %v2232_v4, %v2204_v39 }
 0x373   : > { %v2262_v23 = vadd.f32 %v2261_v30, %v2233_v31 }
 0x375   : > { %2271 = vst [vmem:[%s637_s28 + $0x18] sm:$0xff] %v2262_v23 }
 0x376   : > { %2881 = shalt.err (!%p2878_p3)
}
 0x377   : > { %2643 = dma.vmem_to_hbm [thread:$0]  (%p3076_p4), %s2291_s2, 512, %s2293_s14, %s2273_s18, %s2954_s29, %s2954_s29, %s2955_s24  }
 0x378 PF: > { %s4342_s16 = sld [smem:[#allocation18_spill]] }
 0x379   : > { %s4343_s28 = sld [smem:[#allocation15_spill]] }
 0x37e   : > { %p2670_p5 = scmp.ge.s32.totalorder %s4342_s16, 2 }
 0x37f   : > { %s2325_s22 = sand.u32 1, %s4343_s28  }
 0x380   : > { %p2658_p6 = pnand %p2670_p5, %p3083_p8  ;;  %s2326_s30 = scalar_lea.sflag [#allocation4], %s2325_s22 }
 0x382   : > { %p2659_p7 = pneg %p2658_p6 }
 0x384   : > { %2915 = dma.done.wait (%p2659_p7), %s2326_s30, 512  }
 0x385   : > { %2917 = vsyncadd (%p2659_p7), %s2326_s30, 4294966784  ;;  %s2336_s21 = scalar_lea.sflag [#allocation10], %s2325_s22 }
 0x386   : > { %2919 = dma.done.wait (%p2659_p7), %s2336_s21, 4096  }
 0x387   : > { %2921 = vsyncadd (%p2659_p7), %s2336_s21, 4294963200  ;;  %s34_s23 = sadd.s32 1, %s4342_s16   ;;  %s4345_s29 = sld [smem:[#allocation16_spill]] }
 0x388   : > { %p31_p9 = scmp.ge.s32.totalorder %s34_s23, 4   ;;  %s4346_s20 = sld [smem:[#allocation22_spill]] }
 0x389   : > { %s4347_s21 = sld [smem:[#allocation17_spill]]  ;;  %s4349_s18 = smov %s2928_s19 }
 0x38a   : > { %s4348_s22 = sld [smem:[#allocation19_spill]]  ;;  %33 = sbr.rel (!%p31_p9) target bundleno = 14 (0xe), region = 157 }
 0x38d   : > { %s4350_s19 = smov %s4345_s29 }
 0x38f   :  { %2342 = vsyncpa [#allocation3], 1 }
 0x390   :  { %2344 = vsyncpa [#allocation3 + $0x1], 1 }
 0x391   :  { %2345 = vsyncpa [#allocation6], 1 }
 0x392   :  { %2346 = vsyncpa [#allocation4], 1 }
 0x393   :  { %2348 = vsyncpa [#allocation4 + $0x1], 1 }
 0x394   :  { %2349 = vsyncpa [#allocation10], 1 }
 0x395   :  { %2351 = vsyncpa [#allocation10 + $0x1], 1 }

</bundles_post_ra>
